<compile_context>
chip_gen: v7x
topology: tpu7x:2x2x1
jax: 0.10.0
libtpu: 0.0.40
codegen_flags: <defaults>
</compile_context>

<pallas_src>
import functools

import jax
import jax.numpy as jnp
import numpy as np
from jax import lax
from jax.experimental import pallas as pl
from jax.experimental.pallas import tpu as pltpu

EXPANSION = 4
BN_EPS = 1e-5
VMEM_LIMIT_BYTES = 32 * 1024 * 1024   # <= scoped/physical VMEM on v5e/v6e/v7x


# --------------------------------------------------------------------------
# Fused kernel: one image (one grid step) end-to-end in VMEM
# --------------------------------------------------------------------------
def _bottleneck_kernel(H, W, Ho, Wo, stride, has_proj, cdt, *refs):
    if has_proj:
        (x_ref, w1_ref, b1_ref, w2_ref, b2_ref, w3_ref, b3_ref,
         ws_ref, bs_ref, o_ref, h1p_ref, acc_ref) = refs
    else:
        (x_ref, w1_ref, b1_ref, w2_ref, b2_ref, w3_ref, b3_ref,
         o_ref, h1p_ref, acc_ref) = refs

    Cin = x_ref.shape[-1]
    Cmid = w1_ref.shape[-1]

    # ---- stage 1: 1x1 conv (BN scale pre-folded into w1) + bias + ReLU ------
    x32 = x_ref[0]                                        # (H, W, Cin), f32
    x2d = x32.reshape(H * W, Cin).astype(cdt)             # MXU operand (bf16)
    h1 = jnp.dot(x2d, w1_ref[...], preferred_element_type=jnp.float32)
    h1 = jnp.maximum(h1 + b1_ref[...], 0.0)

    # The conv padding belongs to h1 (after BN/ReLU), NOT to x, so the halo is
    # built here.  Only the 1-px border needs zeroing (the interior is fully
    # overwritten every step), which is safe under "parallel" megacore sharding
    # because nothing persists across steps except the re-zeroed border.
    h1p_ref[0:1, :, :] = jnp.zeros((1, W + 2, Cmid), cdt)
    h1p_ref[H + 1:H + 2, :, :] = jnp.zeros((1, W + 2, Cmid), cdt)
    h1p_ref[1:H + 1, 0:1, :] = jnp.zeros((H, 1, Cmid), cdt)
    h1p_ref[1:H + 1, W + 1:W + 2, :] = jnp.zeros((H, 1, Cmid), cdt)
    h1p_ref[1:H + 1, 1:W + 1, :] = h1.reshape(H, W, Cmid).astype(cdt)

    # ---- stage 2: 3x3 conv = 9 shifted matmuls, grouped per kernel row ------
    # (3 accumulator round-trips instead of 9; no initial zero-store.)
    for ky in range(3):
        row_acc = None
        for kx in range(3):
            if stride == 1:
                patch = h1p_ref[ky:ky + Ho, kx:kx + Wo, :]
            else:
                # TODO(synk): strided-tap read path (stride=2) is not exercised by
                # the demo below; validate pl.ds(stride=) lowering before relying on it.
                patch = h1p_ref[pl.ds(ky, Ho, stride=stride),
                                pl.ds(kx, Wo, stride=stride), :]
            d = jnp.dot(patch.reshape(Ho * Wo, Cmid), w2_ref[3 * ky + kx],
                        preferred_element_type=jnp.float32)
            row_acc = d if row_acc is None else row_acc + d
        if ky == 0:
            acc_ref[...] = row_acc
        else:
            acc_ref[...] += row_acc
    h2 = jnp.maximum(acc_ref[...] + b2_ref[...], 0.0).astype(cdt)

    # ---- stage 3: 1x1 expansion conv (BN scale pre-folded) + bias -----------
    y = jnp.dot(h2, w3_ref[...], preferred_element_type=jnp.float32)
    y = y + b3_ref[...]

    # ---- stage 4: shortcut + residual add + final ReLU ----------------------
    if has_proj:
        if stride == 1:
            xs = x2d
        else:
            xs = x_ref[0, pl.ds(0, Ho, stride=stride),
                       pl.ds(0, Wo, stride=stride), :].reshape(Ho * Wo, Cin)
            xs = xs.astype(cdt)
        sc = jnp.dot(xs, ws_ref[...], preferred_element_type=jnp.float32)
        y = y + (sc + bs_ref[...])
    else:
        # identity shortcut: plain f32 VPU add (no eye-matrix matmul).
        y = y + x32.reshape(H * W, Cin)

    o_ref[0] = jnp.maximum(y, 0.0).astype(o_ref.dtype)


# --------------------------------------------------------------------------
# Wrapper: layout plumbing (NCHW <-> NHWC), BN-scale folding, pallas_call
# --------------------------------------------------------------------------
@functools.partial(jax.jit, static_argnames=("stride", "compute_dtype"))
def bottleneck_forward(x_nchw, params, stride=1, compute_dtype=jnp.bfloat16):
    N, Cin, H, W = x_nchw.shape
    w1_t, w2_t, w3_t, ws_t = (params["w1_t"], params["w2_t"],
                              params["w3_t"], params["ws_t"])
    Cmid = w1_t.shape[0]
    Cout = w3_t.shape[0]
    Ho = (H + 2 - 3) // stride + 1
    Wo = (W + 2 - 3) // stride + 1
    has_proj = (stride != 1) or (Cin != Cout)
    cdt = jnp.dtype(compute_dtype)

    # Fold BN scale into the (bias-free) conv weights (PyTorch OIHW -> matmul
    # layout (Cin, Cout) / per-tap (Cmid, Cmid)), cast to the MXU compute dtype.
    s1, b1 = params["s1"], params["b1"]
    s2, b2 = params["s2"], params["b2"]
    s3, b3 = params["s3"], params["b3"]
    w1 = (w1_t[:, :, 0, 0].T * s1[None, :]).astype(cdt)
    w3 = (w3_t[:, :, 0, 0].T * s3[None, :]).astype(cdt)
    w2r = jnp.stack([w2_t[:, :, ky, kx].T * s2[None, :]
                     for ky in range(3) for kx in range(3)], axis=0).astype(cdt)

    # Per-channel BN biases stay in f32 (epilogue adds run in f32 on the VPU).
    b1r, b2r, b3r = b1.reshape(1, -1), b2.reshape(1, -1), b3.reshape(1, -1)

    x_nhwc = jnp.transpose(x_nchw, (0, 2, 3, 1))          # (N, H, W, Cin)

    full2 = lambda n: (0, 0)
    full3 = lambda n: (0, 0, 0)
    in_specs = [
        pl.BlockSpec((1, H, W, Cin), lambda n: (n, 0, 0, 0)),
        pl.BlockSpec((Cin, Cmid), full2),
        pl.BlockSpec((1, Cmid), full2),
        pl.BlockSpec((9, Cmid, Cmid), full3),
        pl.BlockSpec((1, Cmid), full2),
        pl.BlockSpec((Cmid, Cout), full2),
        pl.BlockSpec((1, Cout), full2),
    ]
    args = [x_nhwc, w1, b1r, w2r, b2r, w3, b3r]
    if has_proj:
        ws = (ws_t[:, :, 0, 0].T * params["ss"][None, :]).astype(cdt)
        in_specs += [pl.BlockSpec((Cin, Cout), full2),
                     pl.BlockSpec((1, Cout), full2)]
        args += [ws, params["bs"].reshape(1, -1)]

    kernel = functools.partial(_bottleneck_kernel, H, W, Ho, Wo, stride,
                               has_proj, cdt)
    out2d = pl.pallas_call(
        kernel,
        out_shape=jax.ShapeDtypeStruct((N, Ho * Wo, Cout), x_nchw.dtype),
        grid=(N,),
        in_specs=in_specs,
        out_specs=pl.BlockSpec((1, Ho * Wo, Cout), lambda n: (n, 0, 0)),
        scratch_shapes=[
            pltpu.VMEM((H + 2, W + 2, Cmid), cdt),       # zero-padded h1 (halo)
            pltpu.VMEM((Ho * Wo, Cmid), jnp.float32),    # 3x3 conv accumulator
        ],
        compiler_params=pltpu.CompilerParams(
            dimension_semantics=("parallel",),
            vmem_limit_bytes=VMEM_LIMIT_BYTES),
    )(*args)

    out = out2d.reshape(N, Ho, Wo, Cout)
    return jnp.transpose(out, (0, 3, 1, 2))   # back to NCHW


# --------------------------------------------------------------------------
# Deterministic parameter construction (shapes from BottleNeck.__init__)
# --------------------------------------------------------------------------
def make_params(key, in_channels, out_channels):
    Cmid = out_channels
    Cout = out_channels * EXPANSION
    ks = jax.random.split(key, 8)

    def conv_w(k, co, ci, kh, kw):
        fan_in = ci * kh * kw
        return (jax.random.normal(k, (co, ci, kh, kw), jnp.float32)
                / np.sqrt(fan_in))

    def bn_fold(k, c):
        k1, k2, k3, k4 = jax.random.split(k, 4)
        gamma = 1.0 + 0.1 * jax.random.normal(k1, (c,), jnp.float32)
        beta = 0.1 * jax.random.normal(k2, (c,), jnp.float32)
        mean = 0.1 * jax.random.normal(k3, (c,), jnp.float32)
        var = jax.random.uniform(k4, (c,), jnp.float32, minval=0.5, maxval=1.5)
        scale = gamma / jnp.sqrt(var + BN_EPS)
        bias = beta - mean * scale
        return scale, bias

    s1, b1 = bn_fold(ks[4], Cmid)
    s2, b2 = bn_fold(ks[5], Cmid)
    s3, b3 = bn_fold(ks[6], Cout)
    ss, bs = bn_fold(ks[7], Cout)
    return dict(
        w1_t=conv_w(ks[0], Cmid, in_channels, 1, 1),
        w2_t=conv_w(ks[1], Cmid, Cmid, 3, 3),
        w3_t=conv_w(ks[2], Cout, Cmid, 1, 1),
        ws_t=conv_w(ks[3], Cout, in_channels, 1, 1),
        s1=s1, b1=b1, s2=s2, b2=b2, s3=s3, b3=b3, ss=ss, bs=bs)


# --------------------------------------------------------------------------
# Pure-JAX reference (NCHW, lax.conv) for correctness checking
# --------------------------------------------------------------------------
def ref_forward(x, params, stride=1):
    def conv(x, w, s=1, pad=0):
        return lax.conv_general_dilated(
            x, w, (s, s), [(pad, pad), (pad, pad)],
            dimension_numbers=("NCHW", "OIHW", "NCHW"))

    def bn(x, scale, bias):
        return x * scale[None, :, None, None] + bias[None, :, None, None]

    Cin, Cout = x.shape[1], params["w3_t"].shape[0]
    h = jax.nn.relu(bn(conv(x, params["w1_t"]), params["s1"], params["b1"]))
    h = jax.nn.relu(bn(conv(h, params["w2_t"], s=stride, pad=1),
                       params["s2"], params["b2"]))
    h = bn(conv(h, params["w3_t"]), params["s3"], params["b3"])
    if stride != 1 or Cin != Cout:
        sc = bn(conv(x, params["ws_t"], s=stride), params["ss"], params["bs"])
    else:
        sc = x
    return jax.nn.relu(h + sc)


def _round_bf16(t):
    return t.astype(jnp.bfloat16).astype(jnp.float32)


if __name__ == "__main__":
    key = jax.random.PRNGKey(0)

    def run_case(in_channels, out_channels, stride, compute_dtype, rtol, atol, k):
        kx, kp = jax.random.split(k)
        N, H, W = 2, 16, 16
        x = jax.random.normal(kx, (N, in_channels, H, W), jnp.float32)
        params = make_params(kp, in_channels, out_channels)
        if compute_dtype == jnp.bfloat16:
            # feed bf16-rounded activations / conv weights to BOTH kernel and
            # reference so the check isolates in-kernel casts / accumulation
            # (the BN-scale folding adds one extra bf16 rounding on the weights).
            x = _round_bf16(x)
            params = {kk: (_round_bf16(v) if kk.startswith("w") else v)
                      for kk, v in params.items()}
        out = jax.block_until_ready(
            bottleneck_forward(x, params, stride=stride,
                               compute_dtype=compute_dtype))
        ref = jax.block_until_ready(ref_forward(x, params, stride=stride))
        np.testing.assert_allclose(np.asarray(out), np.asarray(ref),
                                   rtol=rtol, atol=atol)
        Ho = (H + 2 - 3) // stride + 1
        assert out.shape == (N, out_channels * EXPANSION, Ho, Ho)

    k1, k2, k3 = jax.random.split(key, 3)
    # projection shortcut (Cin != Cout), f32 matmuls: tight structural check
    run_case(4, 4, 1, jnp.float32, 1e-4, 1e-4, k1)
    # projection shortcut, bf16 matmuls (the fast production path)
    run_case(4, 4, 1, jnp.bfloat16, 5e-2, 1e-1, k2)
    # identity shortcut (Cin == out_channels*4): plain residual add, no ws/bs
    run_case(16, 4, 1, jnp.bfloat16, 5e-2, 1e-1, k3)

    print("KERNEL_OK")
</pallas_src>

<mosaic_0001>
module attributes {stable_mosaic.version = 11 : i64} {
  func.func @_bottleneck_kernel(%arg0: i32, %arg1: memref<1x16x16x4xf32, #tpu.memory_space<vmem>>, %arg2: memref<4x4xf32, #tpu.memory_space<vmem>>, %arg3: memref<1x4xf32, #tpu.memory_space<vmem>>, %arg4: memref<9x4x4xf32, #tpu.memory_space<vmem>>, %arg5: memref<1x4xf32, #tpu.memory_space<vmem>>, %arg6: memref<4x16xf32, #tpu.memory_space<vmem>>, %arg7: memref<1x16xf32, #tpu.memory_space<vmem>>, %arg8: memref<4x16xf32, #tpu.memory_space<vmem>>, %arg9: memref<1x16xf32, #tpu.memory_space<vmem>>, %arg10: memref<1x256x16xf32, #tpu.memory_space<vmem>>, %arg11: memref<18x18x4xf32, #tpu.memory_space<vmem>>, %arg12: memref<256x4xf32, #tpu.memory_space<vmem>>) attributes {dimension_semantics = [#tpu.dimension_semantics<parallel>], iteration_bounds = array<i64: 2>, scalar_prefetch = 0 : i64, scratch_operands = 2 : i64, tpu.core_type = #tpu.core_type<tc>, window_params = [{transform_indices = @transform_0, window_bounds = array<i64: 1, 16, 16, 4>}, {pipeline_mode = #tpu.pipeline_mode<synchronous>, transform_indices = @transform_1, window_bounds = array<i64: 4, 4>}, {pipeline_mode = #tpu.pipeline_mode<synchronous>, transform_indices = @transform_2, window_bounds = array<i64: 1, 4>}, {pipeline_mode = #tpu.pipeline_mode<synchronous>, transform_indices = @transform_3, window_bounds = array<i64: 9, 4, 4>}, {pipeline_mode = #tpu.pipeline_mode<synchronous>, transform_indices = @transform_4, window_bounds = array<i64: 1, 4>}, {pipeline_mode = #tpu.pipeline_mode<synchronous>, transform_indices = @transform_5, window_bounds = array<i64: 4, 16>}, {pipeline_mode = #tpu.pipeline_mode<synchronous>, transform_indices = @transform_6, window_bounds = array<i64: 1, 16>}, {pipeline_mode = #tpu.pipeline_mode<synchronous>, transform_indices = @transform_7, window_bounds = array<i64: 4, 16>}, {pipeline_mode = #tpu.pipeline_mode<synchronous>, transform_indices = @transform_8, window_bounds = array<i64: 1, 16>}, {transform_indices = @transform_9, window_bounds = array<i64: 1, 256, 16>}]} {
    %c0 = arith.constant 0 : index
    %c0_0 = arith.constant 0 : index
    %c0_1 = arith.constant 0 : index
    %c0_2 = arith.constant 0 : index
    %0 = vector.load %arg1[%c0, %c0_0, %c0_1, %c0_2] : memref<1x16x16x4xf32, #tpu.memory_space<vmem>>, vector<1x16x16x4xf32>
    %1 = vector.shape_cast %0 : vector<1x16x16x4xf32> to vector<16x16x4xf32>
    %2 = vector.shape_cast %1 : vector<16x16x4xf32> to vector<256x4xf32>
    %c0_3 = arith.constant 0 : index
    %c0_4 = arith.constant 0 : index
    %3 = vector.load %arg2[%c0_3, %c0_4] : memref<4x4xf32, #tpu.memory_space<vmem>>, vector<4x4xf32>
    %cst = arith.constant dense<0.000000e+00> : vector<256x4xf32>
    %4 = tpu.matmul %2, %3, %cst {dimension_numbers = #tpu.dot_dimension_numbers<[1], [0], [0], [1], [0, 0, 1, 1], [], []>} : vector<256x4xf32>, vector<4x4xf32>, vector<256x4xf32> -> vector<256x4xf32>
    %c0_5 = arith.constant 0 : index
    %c0_6 = arith.constant 0 : index
    %5 = vector.load %arg3[%c0_5, %c0_6] : memref<1x4xf32, #tpu.memory_space<vmem>>, vector<1x4xf32>
    %6 = vector.broadcast %5 : vector<1x4xf32> to vector<256x4xf32>
    %7 = arith.addf %4, %6 : vector<256x4xf32>
    %cst_7 = arith.constant 0.000000e+00 : f32
    %8 = vector.broadcast %cst_7 : f32 to vector<256x4xf32>
    %9 = arith.maximumf %7, %8 : vector<256x4xf32>
    %cst_8 = arith.constant 0.000000e+00 : f32
    %10 = vector.broadcast %cst_8 : f32 to vector<1x18x4xf32>
    %c0_9 = arith.constant 0 : index
    %c0_10 = arith.constant 0 : index
    %c0_11 = arith.constant 0 : index
    %11 = vector.load %arg11[%c0_9, %c0_10, %c0_11] : memref<18x18x4xf32, #tpu.memory_space<vmem>>, vector<1x18x4xf32>
    tpu.vector_store %arg11[%c0_9, %c0_10, %c0_11], %10 {strides = array<i32>} : memref<18x18x4xf32, #tpu.memory_space<vmem>>, vector<1x18x4xf32>,
    %cst_12 = arith.constant 0.000000e+00 : f32
    %12 = vector.broadcast %cst_12 : f32 to vector<1x18x4xf32>
    %c17 = arith.constant 17 : index
    %c0_13 = arith.constant 0 : index
    %c0_14 = arith.constant 0 : index
    %13 = vector.load %arg11[%c17, %c0_13, %c0_14] : memref<18x18x4xf32, #tpu.memory_space<vmem>>, vector<1x18x4xf32>
    tpu.vector_store %arg11[%c17, %c0_13, %c0_14], %12 {strides = array<i32>} : memref<18x18x4xf32, #tpu.memory_space<vmem>>, vector<1x18x4xf32>,
    %cst_15 = arith.constant 0.000000e+00 : f32
    %14 = vector.broadcast %cst_15 : f32 to vector<16x1x4xf32>
    %c1 = arith.constant 1 : index
    %c0_16 = arith.constant 0 : index
    %c0_17 = arith.constant 0 : index
    %15 = vector.load %arg11[%c1, %c0_16, %c0_17] : memref<18x18x4xf32, #tpu.memory_space<vmem>>, vector<16x1x4xf32>
    tpu.vector_store %arg11[%c1, %c0_16, %c0_17], %14 {strides = array<i32>} : memref<18x18x4xf32, #tpu.memory_space<vmem>>, vector<16x1x4xf32>,
    %cst_18 = arith.constant 0.000000e+00 : f32
    %16 = vector.broadcast %cst_18 : f32 to vector<16x1x4xf32>
    %c1_19 = arith.constant 1 : index
    %c17_20 = arith.constant 17 : index
    %c0_21 = arith.constant 0 : index
    %17 = vector.load %arg11[%c1_19, %c17_20, %c0_21] : memref<18x18x4xf32, #tpu.memory_space<vmem>>, vector<16x1x4xf32>
    tpu.vector_store %arg11[%c1_19, %c17_20, %c0_21], %16 {strides = array<i32>} : memref<18x18x4xf32, #tpu.memory_space<vmem>>, vector<16x1x4xf32>,
    %18 = vector.shape_cast %9 : vector<256x4xf32> to vector<16x16x4xf32>
    %c1_22 = arith.constant 1 : index
    %c1_23 = arith.constant 1 : index
    %c0_24 = arith.constant 0 : index
    %19 = vector.load %arg11[%c1_22, %c1_23, %c0_24] : memref<18x18x4xf32, #tpu.memory_space<vmem>>, vector<16x16x4xf32>
    tpu.vector_store %arg11[%c1_22, %c1_23, %c0_24], %18 {strides = array<i32>} : memref<18x18x4xf32, #tpu.memory_space<vmem>>, vector<16x16x4xf32>,
    %c0_25 = arith.constant 0 : index
    %c0_26 = arith.constant 0 : index
    %c0_27 = arith.constant 0 : index
    %20 = vector.load %arg11[%c0_25, %c0_26, %c0_27] : memref<18x18x4xf32, #tpu.memory_space<vmem>>, vector<16x16x4xf32>
    %21 = vector.shape_cast %20 : vector<16x16x4xf32> to vector<256x4xf32>
    %c0_28 = arith.constant 0 : index
    %c0_29 = arith.constant 0 : index
    %c0_30 = arith.constant 0 : index
    %22 = vector.load %arg4[%c0_28, %c0_29, %c0_30] : memref<9x4x4xf32, #tpu.memory_space<vmem>>, vector<1x4x4xf32>
    %23 = vector.shape_cast %22 : vector<1x4x4xf32> to vector<4x4xf32>
    %cst_31 = arith.constant dense<0.000000e+00> : vector<256x4xf32>
    %24 = tpu.matmul %21, %23, %cst_31 {dimension_numbers = #tpu.dot_dimension_numbers<[1], [0], [0], [1], [0, 0, 1, 1], [], []>} : vector<256x4xf32>, vector<4x4xf32>, vector<256x4xf32> -> vector<256x4xf32>
    %c0_32 = arith.constant 0 : index
    %c1_33 = arith.constant 1 : index
    %c0_34 = arith.constant 0 : index
    %25 = vector.load %arg11[%c0_32, %c1_33, %c0_34] : memref<18x18x4xf32, #tpu.memory_space<vmem>>, vector<16x16x4xf32>
    %26 = vector.shape_cast %25 : vector<16x16x4xf32> to vector<256x4xf32>
    %c1_35 = arith.constant 1 : index
    %c0_36 = arith.constant 0 : index
    %c0_37 = arith.constant 0 : index
    %27 = vector.load %arg4[%c1_35, %c0_36, %c0_37] : memref<9x4x4xf32, #tpu.memory_space<vmem>>, vector<1x4x4xf32>
    %28 = vector.shape_cast %27 : vector<1x4x4xf32> to vector<4x4xf32>
    %cst_38 = arith.constant dense<0.000000e+00> : vector<256x4xf32>
    %29 = tpu.matmul %26, %28, %cst_38 {dimension_numbers = #tpu.dot_dimension_numbers<[1], [0], [0], [1], [0, 0, 1, 1], [], []>} : vector<256x4xf32>, vector<4x4xf32>, vector<256x4xf32> -> vector<256x4xf32>
    %30 = arith.addf %24, %29 : vector<256x4xf32>
    %c0_39 = arith.constant 0 : index
    %c2 = arith.constant 2 : index
    %c0_40 = arith.constant 0 : index
    %31 = vector.load %arg11[%c0_39, %c2, %c0_40] : memref<18x18x4xf32, #tpu.memory_space<vmem>>, vector<16x16x4xf32>
    %32 = vector.shape_cast %31 : vector<16x16x4xf32> to vector<256x4xf32>
    %c2_41 = arith.constant 2 : index
    %c0_42 = arith.constant 0 : index
    %c0_43 = arith.constant 0 : index
    %33 = vector.load %arg4[%c2_41, %c0_42, %c0_43] : memref<9x4x4xf32, #tpu.memory_space<vmem>>, vector<1x4x4xf32>
    %34 = vector.shape_cast %33 : vector<1x4x4xf32> to vector<4x4xf32>
    %cst_44 = arith.constant dense<0.000000e+00> : vector<256x4xf32>
    %35 = tpu.matmul %32, %34, %cst_44 {dimension_numbers = #tpu.dot_dimension_numbers<[1], [0], [0], [1], [0, 0, 1, 1], [], []>} : vector<256x4xf32>, vector<4x4xf32>, vector<256x4xf32> -> vector<256x4xf32>
    %36 = arith.addf %30, %35 : vector<256x4xf32>
    %c0_45 = arith.constant 0 : index
    %c0_46 = arith.constant 0 : index
    %37 = vector.load %arg12[%c0_45, %c0_46] : memref<256x4xf32, #tpu.memory_space<vmem>>, vector<256x4xf32>
    tpu.vector_store %arg12[%c0_45, %c0_46], %36 {strides = array<i32>} : memref<256x4xf32, #tpu.memory_space<vmem>>, vector<256x4xf32>,
    %c1_47 = arith.constant 1 : index
    %c0_48 = arith.constant 0 : index
    %c0_49 = arith.constant 0 : index
    %38 = vector.load %arg11[%c1_47, %c0_48, %c0_49] : memref<18x18x4xf32, #tpu.memory_space<vmem>>, vector<16x16x4xf32>
    %39 = vector.shape_cast %38 : vector<16x16x4xf32> to vector<256x4xf32>
    %c3 = arith.constant 3 : index
    %c0_50 = arith.constant 0 : index
    %c0_51 = arith.constant 0 : index
    %40 = vector.load %arg4[%c3, %c0_50, %c0_51] : memref<9x4x4xf32, #tpu.memory_space<vmem>>, vector<1x4x4xf32>
    %41 = vector.shape_cast %40 : vector<1x4x4xf32> to vector<4x4xf32>
    %cst_52 = arith.constant dense<0.000000e+00> : vector<256x4xf32>
    %42 = tpu.matmul %39, %41, %cst_52 {dimension_numbers = #tpu.dot_dimension_numbers<[1], [0], [0], [1], [0, 0, 1, 1], [], []>} : vector<256x4xf32>, vector<4x4xf32>, vector<256x4xf32> -> vector<256x4xf32>
    %c1_53 = arith.constant 1 : index
    %c1_54 = arith.constant 1 : index
    %c0_55 = arith.constant 0 : index
    %43 = vector.load %arg11[%c1_53, %c1_54, %c0_55] : memref<18x18x4xf32, #tpu.memory_space<vmem>>, vector<16x16x4xf32>
    %44 = vector.shape_cast %43 : vector<16x16x4xf32> to vector<256x4xf32>
    %c4 = arith.constant 4 : index
    %c0_56 = arith.constant 0 : index
    %c0_57 = arith.constant 0 : index
    %45 = vector.load %arg4[%c4, %c0_56, %c0_57] : memref<9x4x4xf32, #tpu.memory_space<vmem>>, vector<1x4x4xf32>
    %46 = vector.shape_cast %45 : vector<1x4x4xf32> to vector<4x4xf32>
    %cst_58 = arith.constant dense<0.000000e+00> : vector<256x4xf32>
    %47 = tpu.matmul %44, %46, %cst_58 {dimension_numbers = #tpu.dot_dimension_numbers<[1], [0], [0], [1], [0, 0, 1, 1], [], []>} : vector<256x4xf32>, vector<4x4xf32>, vector<256x4xf32> -> vector<256x4xf32>
    %48 = arith.addf %42, %47 : vector<256x4xf32>
    %c1_59 = arith.constant 1 : index
    %c2_60 = arith.constant 2 : index
    %c0_61 = arith.constant 0 : index
    %49 = vector.load %arg11[%c1_59, %c2_60, %c0_61] : memref<18x18x4xf32, #tpu.memory_space<vmem>>, vector<16x16x4xf32>
    %50 = vector.shape_cast %49 : vector<16x16x4xf32> to vector<256x4xf32>
    %c5 = arith.constant 5 : index
    %c0_62 = arith.constant 0 : index
    %c0_63 = arith.constant 0 : index
    %51 = vector.load %arg4[%c5, %c0_62, %c0_63] : memref<9x4x4xf32, #tpu.memory_space<vmem>>, vector<1x4x4xf32>
    %52 = vector.shape_cast %51 : vector<1x4x4xf32> to vector<4x4xf32>
    %cst_64 = arith.constant dense<0.000000e+00> : vector<256x4xf32>
    %53 = tpu.matmul %50, %52, %cst_64 {dimension_numbers = #tpu.dot_dimension_numbers<[1], [0], [0], [1], [0, 0, 1, 1], [], []>} : vector<256x4xf32>, vector<4x4xf32>, vector<256x4xf32> -> vector<256x4xf32>
    %54 = arith.addf %48, %53 : vector<256x4xf32>
    %c0_65 = arith.constant 0 : index
    %c0_66 = arith.constant 0 : index
    %55 = vector.load %arg12[%c0_65, %c0_66] : memref<256x4xf32, #tpu.memory_space<vmem>>, vector<256x4xf32>
    %56 = arith.addf %55, %54 : vector<256x4xf32>
    %c0_67 = arith.constant 0 : index
    %c0_68 = arith.constant 0 : index
    %57 = vector.load %arg12[%c0_67, %c0_68] : memref<256x4xf32, #tpu.memory_space<vmem>>, vector<256x4xf32>
    tpu.vector_store %arg12[%c0_67, %c0_68], %56 {strides = array<i32>} : memref<256x4xf32, #tpu.memory_space<vmem>>, vector<256x4xf32>,
    %c2_69 = arith.constant 2 : index
    %c0_70 = arith.constant 0 : index
    %c0_71 = arith.constant 0 : index
    %58 = vector.load %arg11[%c2_69, %c0_70, %c0_71] : memref<18x18x4xf32, #tpu.memory_space<vmem>>, vector<16x16x4xf32>
    %59 = vector.shape_cast %58 : vector<16x16x4xf32> to vector<256x4xf32>
    %c6 = arith.constant 6 : index
    %c0_72 = arith.constant 0 : index
    %c0_73 = arith.constant 0 : index
    %60 = vector.load %arg4[%c6, %c0_72, %c0_73] : memref<9x4x4xf32, #tpu.memory_space<vmem>>, vector<1x4x4xf32>
    %61 = vector.shape_cast %60 : vector<1x4x4xf32> to vector<4x4xf32>
    %cst_74 = arith.constant dense<0.000000e+00> : vector<256x4xf32>
    %62 = tpu.matmul %59, %61, %cst_74 {dimension_numbers = #tpu.dot_dimension_numbers<[1], [0], [0], [1], [0, 0, 1, 1], [], []>} : vector<256x4xf32>, vector<4x4xf32>, vector<256x4xf32> -> vector<256x4xf32>
    %c2_75 = arith.constant 2 : index
    %c1_76 = arith.constant 1 : index
    %c0_77 = arith.constant 0 : index
    %63 = vector.load %arg11[%c2_75, %c1_76, %c0_77] : memref<18x18x4xf32, #tpu.memory_space<vmem>>, vector<16x16x4xf32>
    %64 = vector.shape_cast %63 : vector<16x16x4xf32> to vector<256x4xf32>
    %c7 = arith.constant 7 : index
    %c0_78 = arith.constant 0 : index
    %c0_79 = arith.constant 0 : index
    %65 = vector.load %arg4[%c7, %c0_78, %c0_79] : memref<9x4x4xf32, #tpu.memory_space<vmem>>, vector<1x4x4xf32>
    %66 = vector.shape_cast %65 : vector<1x4x4xf32> to vector<4x4xf32>
    %cst_80 = arith.constant dense<0.000000e+00> : vector<256x4xf32>
    %67 = tpu.matmul %64, %66, %cst_80 {dimension_numbers = #tpu.dot_dimension_numbers<[1], [0], [0], [1], [0, 0, 1, 1], [], []>} : vector<256x4xf32>, vector<4x4xf32>, vector<256x4xf32> -> vector<256x4xf32>
    %68 = arith.addf %62, %67 : vector<256x4xf32>
    %c2_81 = arith.constant 2 : index
    %c2_82 = arith.constant 2 : index
    %c0_83 = arith.constant 0 : index
    %69 = vector.load %arg11[%c2_81, %c2_82, %c0_83] : memref<18x18x4xf32, #tpu.memory_space<vmem>>, vector<16x16x4xf32>
    %70 = vector.shape_cast %69 : vector<16x16x4xf32> to vector<256x4xf32>
    %c8 = arith.constant 8 : index
    %c0_84 = arith.constant 0 : index
    %c0_85 = arith.constant 0 : index
    %71 = vector.load %arg4[%c8, %c0_84, %c0_85] : memref<9x4x4xf32, #tpu.memory_space<vmem>>, vector<1x4x4xf32>
    %72 = vector.shape_cast %71 : vector<1x4x4xf32> to vector<4x4xf32>
    %cst_86 = arith.constant dense<0.000000e+00> : vector<256x4xf32>
    %73 = tpu.matmul %70, %72, %cst_86 {dimension_numbers = #tpu.dot_dimension_numbers<[1], [0], [0], [1], [0, 0, 1, 1], [], []>} : vector<256x4xf32>, vector<4x4xf32>, vector<256x4xf32> -> vector<256x4xf32>
    %74 = arith.addf %68, %73 : vector<256x4xf32>
    %c0_87 = arith.constant 0 : index
    %c0_88 = arith.constant 0 : index
    %75 = vector.load %arg12[%c0_87, %c0_88] : memref<256x4xf32, #tpu.memory_space<vmem>>, vector<256x4xf32>
    %76 = arith.addf %75, %74 : vector<256x4xf32>
    %c0_89 = arith.constant 0 : index
    %c0_90 = arith.constant 0 : index
    %77 = vector.load %arg12[%c0_89, %c0_90] : memref<256x4xf32, #tpu.memory_space<vmem>>, vector<256x4xf32>
    tpu.vector_store %arg12[%c0_89, %c0_90], %76 {strides = array<i32>} : memref<256x4xf32, #tpu.memory_space<vmem>>, vector<256x4xf32>,
    %c0_91 = arith.constant 0 : index
    %c0_92 = arith.constant 0 : index
    %78 = vector.load %arg12[%c0_91, %c0_92] : memref<256x4xf32, #tpu.memory_space<vmem>>, vector<256x4xf32>
    %c0_93 = arith.constant 0 : index
    %c0_94 = arith.constant 0 : index
    %79 = vector.load %arg5[%c0_93, %c0_94] : memref<1x4xf32, #tpu.memory_space<vmem>>, vector<1x4xf32>
    %80 = vector.broadcast %79 : vector<1x4xf32> to vector<256x4xf32>
    %81 = arith.addf %78, %80 : vector<256x4xf32>
    %cst_95 = arith.constant 0.000000e+00 : f32
    %82 = vector.broadcast %cst_95 : f32 to vector<256x4xf32>
    %83 = arith.maximumf %81, %82 : vector<256x4xf32>
    %c0_96 = arith.constant 0 : index
    %c0_97 = arith.constant 0 : index
    %84 = vector.load %arg6[%c0_96, %c0_97] : memref<4x16xf32, #tpu.memory_space<vmem>>, vector<4x16xf32>
    %cst_98 = arith.constant dense<0.000000e+00> : vector<256x16xf32>
    %85 = tpu.matmul %83, %84, %cst_98 {dimension_numbers = #tpu.dot_dimension_numbers<[1], [0], [0], [1], [0, 0, 1, 1], [], []>} : vector<256x4xf32>, vector<4x16xf32>, vector<256x16xf32> -> vector<256x16xf32>
    %c0_99 = arith.constant 0 : index
    %c0_100 = arith.constant 0 : index
    %86 = vector.load %arg7[%c0_99, %c0_100] : memref<1x16xf32, #tpu.memory_space<vmem>>, vector<1x16xf32>
    %87 = vector.broadcast %86 : vector<1x16xf32> to vector<256x16xf32>
    %88 = arith.addf %85, %87 : vector<256x16xf32>
    %c0_101 = arith.constant 0 : index
    %c0_102 = arith.constant 0 : index
    %89 = vector.load %arg8[%c0_101, %c0_102] : memref<4x16xf32, #tpu.memory_space<vmem>>, vector<4x16xf32>
    %cst_103 = arith.constant dense<0.000000e+00> : vector<256x16xf32>
    %90 = tpu.matmul %2, %89, %cst_103 {dimension_numbers = #tpu.dot_dimension_numbers<[1], [0], [0], [1], [0, 0, 1, 1], [], []>} : vector<256x4xf32>, vector<4x16xf32>, vector<256x16xf32> -> vector<256x16xf32>
    %c0_104 = arith.constant 0 : index
    %c0_105 = arith.constant 0 : index
    %91 = vector.load %arg9[%c0_104, %c0_105] : memref<1x16xf32, #tpu.memory_space<vmem>>, vector<1x16xf32>
    %92 = vector.broadcast %91 : vector<1x16xf32> to vector<256x16xf32>
    %93 = arith.addf %90, %92 : vector<256x16xf32>
    %94 = arith.addf %88, %93 : vector<256x16xf32>
    %cst_106 = arith.constant 0.000000e+00 : f32
    %95 = vector.broadcast %cst_106 : f32 to vector<256x16xf32>
    %96 = arith.maximumf %94, %95 : vector<256x16xf32>
    %c0_107 = arith.constant 0 : index
    %c0_108 = arith.constant 0 : index
    %c0_109 = arith.constant 0 : index
    %97 = vector.load %arg10[%c0_107, %c0_108, %c0_109] : memref<1x256x16xf32, #tpu.memory_space<vmem>>, vector<1x256x16xf32>
    %98 = vector.shape_cast %97 : vector<1x256x16xf32> to vector<256x16xf32>
    %99 = vector.shape_cast %96 : vector<256x16xf32> to vector<1x256x16xf32>
    tpu.vector_store %arg10[%c0_107, %c0_108, %c0_109], %99 {strides = array<i32>} : memref<1x256x16xf32, #tpu.memory_space<vmem>>, vector<1x256x16xf32>,
    return
  }
  func.func @transform_0(%arg0: i32) -> (i32, i32, i32, i32) {
    %c0_i32 = arith.constant 0 : i32
    %c0_i32_0 = arith.constant 0 : i32
    %c0_i32_1 = arith.constant 0 : i32
    %c0_i32_2 = arith.constant 0 : i32
    return %arg0, %c0_i32, %c0_i32_0, %c0_i32_1 : i32, i32, i32, i32
  }
  func.func @transform_1(%arg0: i32) -> (i32, i32) {
    %c0_i32 = arith.constant 0 : i32
    %c0_i32_0 = arith.constant 0 : i32
    %c0_i32_1 = arith.constant 0 : i32
    return %c0_i32, %c0_i32_0 : i32, i32
  }
  func.func @transform_2(%arg0: i32) -> (i32, i32) {
    %c0_i32 = arith.constant 0 : i32
    %c0_i32_0 = arith.constant 0 : i32
    %c0_i32_1 = arith.constant 0 : i32
    return %c0_i32, %c0_i32_0 : i32, i32
  }
  func.func @transform_3(%arg0: i32) -> (i32, i32, i32) {
    %c0_i32 = arith.constant 0 : i32
    %c0_i32_0 = arith.constant 0 : i32
    %c0_i32_1 = arith.constant 0 : i32
    %c0_i32_2 = arith.constant 0 : i32
    return %c0_i32, %c0_i32_0, %c0_i32_1 : i32, i32, i32
  }
  func.func @transform_4(%arg0: i32) -> (i32, i32) {
    %c0_i32 = arith.constant 0 : i32
    %c0_i32_0 = arith.constant 0 : i32
    %c0_i32_1 = arith.constant 0 : i32
    return %c0_i32, %c0_i32_0 : i32, i32
  }
  func.func @transform_5(%arg0: i32) -> (i32, i32) {
    %c0_i32 = arith.constant 0 : i32
    %c0_i32_0 = arith.constant 0 : i32
    %c0_i32_1 = arith.constant 0 : i32
    return %c0_i32, %c0_i32_0 : i32, i32
  }
  func.func @transform_6(%arg0: i32) -> (i32, i32) {
    %c0_i32 = arith.constant 0 : i32
    %c0_i32_0 = arith.constant 0 : i32
    %c0_i32_1 = arith.constant 0 : i32
    return %c0_i32, %c0_i32_0 : i32, i32
  }
  func.func @transform_7(%arg0: i32) -> (i32, i32) {
    %c0_i32 = arith.constant 0 : i32
    %c0_i32_0 = arith.constant 0 : i32
    %c0_i32_1 = arith.constant 0 : i32
    return %c0_i32, %c0_i32_0 : i32, i32
  }
  func.func @transform_8(%arg0: i32) -> (i32, i32) {
    %c0_i32 = arith.constant 0 : i32
    %c0_i32_0 = arith.constant 0 : i32
    %c0_i32_1 = arith.constant 0 : i32
    return %c0_i32, %c0_i32_0 : i32, i32
  }
  func.func @transform_9(%arg0: i32) -> (i32, i32, i32) {
    %c0_i32 = arith.constant 0 : i32
    %c0_i32_0 = arith.constant 0 : i32
    %c0_i32_1 = arith.constant 0 : i32
    return %arg0, %c0_i32, %c0_i32_0 : i32, i32, i32
  }
}

</mosaic_0001>

<bundles_post_ra>
// kernel: bottleneck_forward.1
= control target key start
LH: loop header
LB: loop body
LE: loop exit
PB: predicated region body
PF: predicated region fallthrough
CT: control target
= control target key end

     0   :  { %s6975_s30 = smov 0   ;;  %s8311_s0 = inlined_call_operand.vmem [shape: f32[2,16,16,4], index: 0, kind: input, shape index: {}]   ;;  %s8312_s1 = inlined_call_operand.vmem [shape: f32[4,4], index: 1, kind: input, shape index: {}]   ;;  %s8313_s2 = inlined_call_operand.vmem [shape: f32[1,4], index: 2, kind: input, shape index: {}]   ;;  %s8314_s3 = inlined_call_operand.vmem [shape: f32[9,4,4], index: 3, kind: input, shape index: {}]   ;;  %s8315_s4 = inlined_call_operand.vmem [shape: f32[1,4], index: 4, kind: input, shape index: {}]   ;;  %s8316_s5 = inlined_call_operand.vmem [shape: f32[4,16], index: 5, kind: input, shape index: {}]   ;;  %s8317_s6 = inlined_call_operand.vmem [shape: f32[1,16], index: 6, kind: input, shape index: {}]   ;;  %s8318_s7 = inlined_call_operand.vmem [shape: f32[4,16], index: 7, kind: input, shape index: {}]   ;;  %s8319_s8 = inlined_call_operand.vmem [shape: f32[1,16], index: 8, kind: input, shape index: {}]   ;;  %s8320_s9 = inlined_call_operand.vmem [shape: f32[2,256,16], index: 9, kind: output, shape index: {}]  }
   0x1 LB: > { %s5170_s10 = sadd.s32 4294967295, %s6922_s30   ;;  %p5174_p0 = scmp.ge.s32.totalorder %s6922_s30, 1  ;;  %s6922_s30 = sphi %s6975_s30, %s19_s30  }
   0x2   : > { %p287_p1 = scmp.lt.s32.totalorder %s6922_s30, 3 }
   0x4   : > { %p288_p2 = pnand %p5174_p0, %p287_p1 }
   0x6   : > { %291 = sbr.rel (%p288_p2) target bundleno = 1132 (0x46c), region = 56 }
   0xd   : > { %v365_v0 = vld [vmem:[%s8312_s1] sm:$0xf]  ;;  %vm470_vm0 = vcmask 1043456   ;;  %p323_p3 = scmp.lt.s32.totalorder %s5170_s10, 1  ;;  %vm373_vm1 = vcmask 31744   ;;  %v6924_v33 = vmov 0.0  }
   0xe   : > { %5987 = vmatprep.subr.msk.mxu0 %vm470_vm0, %v365_v0  ;;  %731 = vst.msk [vmem:[#allocation2] sm:$0xff] %vm373_vm1, %v6924_v33  ;;  %732 = vst.msk [vmem:[#allocation2 + $0x8] sm:$0xff] %vm373_vm1, %v6924_v33  ;;  %vm733_vm2 = vcmask 25600   ;;  %vm740_vm3 = vcmask 24576   ;;  %v5213_v34 = vld [vmem:[%s8314_s3 + $0x4] sm:$0xf] }
   0xf   : > { %5988 = vmatpush3.msk.msra.mxu0 %vm470_vm0, %v365_v0  ;;  %s8406_s10 = smov (!%p323_p3, %s5170_s10), 1  ;;  %736 = vst.msk [vmem:[#allocation2 + $0x198] sm:$0xff] %vm373_vm1, %v6924_v33  ;;  %737 = vst.msk [vmem:[#allocation2 + $0x1a0] sm:$0xff] %vm373_vm1, %v6924_v33  ;;  %6037 = vmatprep.subr.msk.mxu1 %vm470_vm0, %v5213_v34  ;;  %v5315_v37 = vld [vmem:[%s8314_s3 + $0x10] sm:$0xf]  ;;  %vm5082_vm4 = vcmask 130048  }
  0x10   : > { %s5589_s13 = sshll.u32 %s8406_s10, 8  ;;  %734 = vst.msk [vmem:[#allocation2 + $0x10] sm:$0x3] %vm733_vm2, %v6924_v33  ;;  %738 = vst.msk [vmem:[#allocation2 + $0x1a8] sm:$0x3] %vm733_vm2, %v6924_v33  ;;  %6038 = vmatpush3.msk.msra.mxu1 %vm470_vm0, %v5213_v34  ;;  %6187 = vmatprep.subr.msk.mxu0 %vm470_vm0, %v5315_v37 }
  0x11   : > { %s6996_s16 = scalar_lea.vmem %s8311_s0, %s5589_s13  ;;  %741 = vst.msk [vmem:[#allocation2 + $0x18] sm:$0x1] %vm740_vm3, %v6924_v33  ;;  %742 = vst.msk [vmem:[#allocation2 + $0x30] sm:$0x1] %vm740_vm3, %v6924_v33  ;;  %v837_v38 = vld [vmem:[%s8314_s3] sm:$0xf]  ;;  %s8212_s12 = scalar_lea.vmem %s8320_s9, %s5589_s13 }
  0x12   : > { %v333_v1 = vld [vmem:[%s6996_s16] sm:$0xff]  ;;  %v334_v2 = vld [vmem:[%s6996_s16 + $0x8] sm:$0xff]  ;;  %v335_v3 = vld [vmem:[%s6996_s16 + $0x10] sm:$0xff]  ;;  %743 = vst.msk [vmem:[#allocation2 + $0x48] sm:$0x1] %vm740_vm3, %v6924_v33  ;;  %6087 = vmatprep.subr.msk.mxu1 %vm470_vm0, %v837_v38 }
  0x13   : > { %5989 = vmatprep.mubr.msk.f32.mxu0 %vm373_vm1, %v333_v1  ;;  %v336_v4 = vld [vmem:[%s6996_s16 + $0x18] sm:$0xff]  ;;  %v337_v5 = vld [vmem:[%s6996_s16 + $0x20] sm:$0xff]  ;;  %v338_v6 = vld [vmem:[%s6996_s16 + $0x28] sm:$0xff]  ;;  %744 = vst.msk [vmem:[#allocation2 + $0x60] sm:$0x1] %vm740_vm3, %v6924_v33 }
  0x14   : > { %5990 = vmatmul.mubr.msk.f32.vlgmr.msra.gmra.mrb[0].mxu0 %vm373_vm1, %v334_v2  ;;  %v339_v7 = vld [vmem:[%s6996_s16 + $0x30] sm:$0xff]  ;;  %v340_v8 = vld [vmem:[%s6996_s16 + $0x38] sm:$0xff]  ;;  %v341_v9 = vld [vmem:[%s6996_s16 + $0x40] sm:$0xff]  ;;  %745 = vst.msk [vmem:[#allocation2 + $0x78] sm:$0x1] %vm740_vm3, %v6924_v33 }
  0x15   : > { %5992 = vmatprep.mubr.msk.f32.mxu0 %vm373_vm1, %v335_v3  ;;  %v342_v10 = vld [vmem:[%s6996_s16 + $0x48] sm:$0xff]  ;;  %v343_v11 = vld [vmem:[%s6996_s16 + $0x50] sm:$0xff]  ;;  %v344_v12 = vld [vmem:[%s6996_s16 + $0x58] sm:$0xff]  ;;  %746 = vst.msk [vmem:[#allocation2 + $0x90] sm:$0x1] %vm740_vm3, %v6924_v33  ;;  %6188 = vmatpush3.msk.msra.mxu0 %vm470_vm0, %v5315_v37 }
  0x16   : > { %v345_v13 = vld [vmem:[%s6996_s16 + $0x60] sm:$0xff]  ;;  %v346_v14 = vld [vmem:[%s6996_s16 + $0x68] sm:$0xff]  ;;  %v347_v15 = vld [vmem:[%s6996_s16 + $0x70] sm:$0xff]  ;;  %747 = vst.msk [vmem:[#allocation2 + $0xa8] sm:$0x1] %vm740_vm3, %v6924_v33 }
  0x17   : > { %v348_v16 = vld [vmem:[%s6996_s16 + $0x78] sm:$0xff]  ;;  %v349_v17 = vld [vmem:[%s6996_s16 + $0x80] sm:$0xff]  ;;  %v350_v18 = vld [vmem:[%s6996_s16 + $0x88] sm:$0xff]  ;;  %748 = vst.msk [vmem:[#allocation2 + $0xc0] sm:$0x1] %vm740_vm3, %v6924_v33 }
  0x18   : > { %5993 = vmatmul.mubr.msk.f32.gmra.mrb[2].mxu0 %vm373_vm1, %v336_v4  ;;  %v351_v19 = vld [vmem:[%s6996_s16 + $0x90] sm:$0xff]  ;;  %v352_v20 = vld [vmem:[%s6996_s16 + $0x98] sm:$0xff]  ;;  %v353_v21 = vld [vmem:[%s6996_s16 + $0xa0] sm:$0xff]  ;;  %749 = vst.msk [vmem:[#allocation2 + $0xd8] sm:$0x1] %vm740_vm3, %v6924_v33 }
  0x19   : > { %5995 = vmatprep.mubr.msk.f32.mxu0 %vm373_vm1, %v337_v5  ;;  %v354_v22 = vld [vmem:[%s6996_s16 + $0xa8] sm:$0xff]  ;;  %v355_v23 = vld [vmem:[%s6996_s16 + $0xb0] sm:$0xff]  ;;  %v356_v24 = vld [vmem:[%s6996_s16 + $0xb8] sm:$0xff]  ;;  %750 = vst.msk [vmem:[#allocation2 + $0xf0] sm:$0x1] %vm740_vm3, %v6924_v33 }
  0x1a   : > { %v357_v25 = vld [vmem:[%s6996_s16 + $0xc0] sm:$0xff]  ;;  %v358_v26 = vld [vmem:[%s6996_s16 + $0xc8] sm:$0xff]  ;;  %v359_v27 = vld [vmem:[%s6996_s16 + $0xd0] sm:$0xff]  ;;  %751 = vst.msk [vmem:[#allocation2 + $0x108] sm:$0x1] %vm740_vm3, %v6924_v33 }
  0x1b   : > { %v360_v28 = vld [vmem:[%s6996_s16 + $0xd8] sm:$0xff]  ;;  %v361_v29 = vld [vmem:[%s6996_s16 + $0xe0] sm:$0xff]  ;;  %v362_v30 = vld [vmem:[%s6996_s16 + $0xe8] sm:$0xff]  ;;  %752 = vst.msk [vmem:[#allocation2 + $0x120] sm:$0x1] %vm740_vm3, %v6924_v33 }
  0x1c   : > { %5996 = vmatmul.mubr.msk.f32.gmra.mrb[4].mxu0 %vm373_vm1, %v338_v6  ;;  %v363_v31 = vld [vmem:[%s6996_s16 + $0xf0] sm:$0xff]  ;;  %v364_v32 = vld [vmem:[%s6996_s16 + $0xf8] sm:$0xff]  ;;  %753 = vst.msk [vmem:[#allocation2 + $0x138] sm:$0x1] %vm740_vm3, %v6924_v33  ;;  %754 = vst.msk [vmem:[#allocation2 + $0x150] sm:$0x1] %vm740_vm3, %v6924_v33 }
  0x1d   : > { %5998 = vmatprep.mubr.msk.f32.mxu0 %vm373_vm1, %v339_v7  ;;  %755 = vst.msk [vmem:[#allocation2 + $0x168] sm:$0x1] %vm740_vm3, %v6924_v33  ;;  %756 = vst.msk [vmem:[#allocation2 + $0x180] sm:$0x1] %vm740_vm3, %v6924_v33  ;;  %v838_v35 = vld [vmem:[#allocation2 + $0x1] sm:$0xff]  ;;  %v839_v36 = vld [vmem:[#allocation2 + $0x9] sm:$0xff] }
  0x1e   : > { %757 = vst.msk [vmem:[#allocation2 + $0x29] sm:$0x1] %vm740_vm3, %v6924_v33  ;;  %758 = vst.msk [vmem:[#allocation2 + $0x41] sm:$0x1] %vm740_vm3, %v6924_v33  ;;  %6039 = vmatprep.mubr.msk.f32.mxu1 %vm373_vm1, %v838_v35  ;;  %v7118_v39 = vld [vmem:[%s8314_s3 + $0x8] sm:$0xf] }
  0x1f   : > { %759 = vst.msk [vmem:[#allocation2 + $0x59] sm:$0x1] %vm740_vm3, %v6924_v33  ;;  %760 = vst.msk [vmem:[#allocation2 + $0x71] sm:$0x1] %vm740_vm3, %v6924_v33  ;;  %6040 = vmatmul.mubr.msk.f32.vlgmr.msra.gmra.mrb[0].mxu1 %vm373_vm1, %v839_v36  ;;  %v5314_v40 = vld [vmem:[%s8314_s3 + $0xc] sm:$0xf] }
  0x20   : > { %5999 = vmatmul.mubr.msk.f32.gmra.mrb[6].mxu0 %vm373_vm1, %v340_v8  ;;  %761 = vst.msk [vmem:[#allocation2 + $0x89] sm:$0x1] %vm740_vm3, %v6924_v33  ;;  %762 = vst.msk [vmem:[#allocation2 + $0xa1] sm:$0x1] %vm740_vm3, %v6924_v33  ;;  %6088 = vmatpush3.msk.msra.mxu1 %vm470_vm0, %v837_v38  ;;  %v7129_v41 = vld [vmem:[%s8313_s2] ss:$0 sm:$0xff] }
  0x21   : > { %6001 = vmatprep.mubr.msk.f32.mxu0 %vm373_vm1, %v341_v9  ;;  %763 = vst.msk [vmem:[#allocation2 + $0xb9] sm:$0x1] %vm740_vm3, %v6924_v33  ;;  %764 = vst.msk [vmem:[#allocation2 + $0xd1] sm:$0x1] %vm740_vm3, %v6924_v33  ;;  %6137 = vmatprep.subr.msk.mxu1 %vm470_vm0, %v7118_v39  ;;  %v7150_v2 = vld [vmem:[%s8314_s3 + $0x14] sm:$0xf] }
  0x22   : > { %765 = vst.msk [vmem:[#allocation2 + $0xe9] sm:$0x1] %vm740_vm3, %v6924_v33  ;;  %766 = vst.msk [vmem:[#allocation2 + $0x101] sm:$0x1] %vm740_vm3, %v6924_v33  ;;  %6237 = vmatprep.subr.msk.mxu0 %vm470_vm0, %v5314_v40 }
  0x23   : > { %767 = vst.msk [vmem:[#allocation2 + $0x119] sm:$0x1] %vm740_vm3, %v6924_v33  ;;  %768 = vst.msk [vmem:[#allocation2 + $0x131] sm:$0x1] %vm740_vm3, %v6924_v33 }
  0x24   : > { %6002 = vmatmul.mubr.msk.f32.gmra.mrb[8].mxu0 %vm373_vm1, %v342_v10  ;;  %769 = vst.msk [vmem:[#allocation2 + $0x149] sm:$0x1] %vm740_vm3, %v6924_v33  ;;  %770 = vst.msk [vmem:[#allocation2 + $0x161] sm:$0x1] %vm740_vm3, %v6924_v33 }
  0x25   : > { %6004 = vmatprep.mubr.msk.f32.mxu0 %vm373_vm1, %v343_v11  ;;  %771 = vst.msk [vmem:[#allocation2 + $0x179] sm:$0x1] %vm740_vm3, %v6924_v33  ;;  %772 = vst.msk [vmem:[#allocation2 + $0x191] sm:$0x1] %vm740_vm3, %v6924_v33 }
  0x28   : > { %6005 = vmatmul.mubr.msk.f32.gmra.mrb[10].mxu0 %vm373_vm1, %v344_v12 }
  0x29   : > { %6007 = vmatprep.mubr.msk.f32.mxu0 %vm373_vm1, %v345_v13 }
  0x2c   : > { %6008 = vmatmul.mubr.msk.f32.gmra.mrb[12].mxu0 %vm373_vm1, %v346_v14 }
  0x2d   : > { %6010 = vmatprep.mubr.msk.f32.mxu0 %vm373_vm1, %v347_v15 }
  0x30   : > { %6011 = vmatmul.mubr.msk.f32.gmra.mrb[14].mxu0 %vm373_vm1, %v348_v16 }
  0x31   : > { %6013 = vmatprep.mubr.msk.f32.mxu0 %vm373_vm1, %v349_v17 }
  0x34   : > { %6014 = vmatmul.mubr.msk.f32.gmra.mrb[16].mxu0 %vm373_vm1, %v350_v18 }
  0x35   : > { %6016 = vmatprep.mubr.msk.f32.mxu0 %vm373_vm1, %v351_v19 }
  0x38   : > { %6017 = vmatmul.mubr.msk.f32.gmra.mrb[18].mxu0 %vm373_vm1, %v352_v20 }
  0x39   : > { %6019 = vmatprep.mubr.msk.f32.mxu0 %vm373_vm1, %v353_v21 }
  0x3c   : > { %6020 = vmatmul.mubr.msk.f32.gmra.mrb[20].mxu0 %vm373_vm1, %v354_v22 }
  0x3d   : > { %6022 = vmatprep.mubr.msk.f32.mxu0 %vm373_vm1, %v355_v23 }
  0x40   : > { %6023 = vmatmul.mubr.msk.f32.gmra.mrb[22].mxu0 %vm373_vm1, %v356_v24 }
  0x41   : > { %6025 = vmatprep.mubr.msk.f32.mxu0 %vm373_vm1, %v357_v25 }
  0x44   : > { %6026 = vmatmul.mubr.msk.f32.gmra.mrb[24].mxu0 %vm373_vm1, %v358_v26 }
  0x45   : > { %6028 = vmatprep.mubr.msk.f32.mxu0 %vm373_vm1, %v359_v27 }
  0x48   : > { %6029 = vmatmul.mubr.msk.f32.gmra.mrb[26].mxu0 %vm373_vm1, %v360_v28 }
  0x49   : > { %6031 = vmatprep.mubr.msk.f32.mxu0 %vm373_vm1, %v361_v29 }
  0x4c   : > { %6032 = vmatmul.mubr.msk.f32.gmra.mrb[28].mxu0 %vm373_vm1, %v362_v30 }
  0x4d   : > { %6034 = vmatprep.mubr.msk.f32.mxu0 %vm373_vm1, %v363_v31 }
  0x50   : > { %6035 = vmatmul.mubr.msk.f32.gmra.mrb[30].mxu0 %vm373_vm1, %v364_v32 }
  0xe7   : > { %v5991_v42 = vpop.f32.mrb[0].mxu0 }
  0xe8   : > { %v546_v43 = vadd.f32 %v5991_v42, %v7129_v41  ;;  %v540_v44 = vpop.f32.mrb[1].mxu0 }
  0xe9   : > { %v541_v45 = vadd.f32 %v7129_v41, %v540_v44 }
  0xea   : > { %v700_v46 = vmax.f32 %v546_v43, 0.0 }
  0xeb   : > { %v699_v47 = vmax.f32 %v541_v45, 0.0  ;;  %v5994_v48 = vpop.f32.mrb[2].mxu0 }
  0xec   : > { %774 = vst.msk [vmem:[#allocation2 + $0x21] sm:$0xff] %vm373_vm1, %v700_v46  ;;  %v556_v49 = vadd.f32 %v5994_v48, %v7129_v41  ;;  %v550_v50 = vpop.f32.mrb[3].mxu0 }
  0xed   : > { %773 = vst.msk [vmem:[#allocation2 + $0x19] sm:$0xff] %vm373_vm1, %v699_v47  ;;  %v551_v51 = vadd.f32 %v7129_v41, %v550_v50 }
  0xee   : > { %v702_v52 = vmax.f32 %v556_v49, 0.0 }
  0xef   : > { %v701_v53 = vmax.f32 %v551_v51, 0.0  ;;  %v5997_v54 = vpop.f32.mrb[4].mxu0 }
  0xf0   : > { %776 = vst.msk [vmem:[#allocation2 + $0x39] sm:$0xff] %vm373_vm1, %v702_v52  ;;  %v566_v55 = vadd.f32 %v5997_v54, %v7129_v41  ;;  %v560_v56 = vpop.f32.mrb[5].mxu0 }
  0xf1   : > { %775 = vst.msk [vmem:[#allocation2 + $0x31] sm:$0xff] %vm373_vm1, %v701_v53  ;;  %v561_v57 = vadd.f32 %v7129_v41, %v560_v56 }
  0xf2   : > { %v704_v58 = vmax.f32 %v566_v55, 0.0 }
  0xf3   : > { %v703_v59 = vmax.f32 %v561_v57, 0.0  ;;  %v6000_v60 = vpop.f32.mrb[6].mxu0  ;;  %v841_v1 = vld [vmem:[#allocation2 + $0x21] sm:$0xff] }
  0xf4   : > { %778 = vst.msk [vmem:[#allocation2 + $0x51] sm:$0xff] %vm373_vm1, %v704_v58  ;;  %v576_v61 = vadd.f32 %v6000_v60, %v7129_v41  ;;  %v570_v62 = vpop.f32.mrb[7].mxu0  ;;  %v840_v63 = vld [vmem:[#allocation2 + $0x19] sm:$0xff] }
  0xf5   : > { %777 = vst.msk [vmem:[#allocation2 + $0x49] sm:$0xff] %vm373_vm1, %v703_v59  ;;  %v571_v0 = vadd.f32 %v7129_v41, %v570_v62  ;;  %6042 = vmatprep.mubr.msk.f32.mxu1 %vm373_vm1, %v840_v63  ;;  %6189 = vmatprep.mubr.msk.f32.mxu0 %vm373_vm1, %v840_v63 }
  0xf6   : > { %v706_v3 = vmax.f32 %v576_v61, 0.0  ;;  %6043 = vmatmul.mubr.msk.f32.gmra.mrb[2].mxu1 %vm373_vm1, %v841_v1  ;;  %6190 = vmatmul.mubr.msk.f32.vlgmr.msra.gmra.mrb[32].mxu0 %vm373_vm1, %v841_v1 }
  0xf7   : > { %v705_v4 = vmax.f32 %v571_v0, 0.0  ;;  %v6003_v5 = vpop.f32.mrb[8].mxu0  ;;  %6238 = vmatpush3.msk.msra.mxu0 %vm470_vm0, %v5314_v40  ;;  %v7167_v10 = vld [vmem:[#allocation2 + $0x39] sm:$0xff] }
  0xf8   : > { %780 = vst.msk [vmem:[#allocation2 + $0x69] sm:$0xff] %vm373_vm1, %v706_v3  ;;  %v586_v6 = vadd.f32 %v6003_v5, %v7129_v41  ;;  %v580_v7 = vpop.f32.mrb[9].mxu0  ;;  %v7157_v8 = vld [vmem:[#allocation2 + $0x31] sm:$0xff]  ;;  %6287 = vmatprep.subr.msk.mxu0 %vm470_vm0, %v7150_v2 }
  0xf9   : > { %779 = vst.msk [vmem:[#allocation2 + $0x61] sm:$0xff] %vm373_vm1, %v705_v4  ;;  %v581_v9 = vadd.f32 %v7129_v41, %v580_v7  ;;  %6045 = vmatprep.mubr.msk.f32.mxu1 %vm373_vm1, %v7157_v8  ;;  %6192 = vmatprep.mubr.msk.f32.mxu0 %vm373_vm1, %v7157_v8 }
  0xfa   : > { %v708_v11 = vmax.f32 %v586_v6, 0.0  ;;  %6046 = vmatmul.mubr.msk.f32.gmra.mrb[4].mxu1 %vm373_vm1, %v7167_v10  ;;  %6193 = vmatmul.mubr.msk.f32.gmra.mrb[34].mxu0 %vm373_vm1, %v7167_v10 }
  0xfb   : > { %v707_v12 = vmax.f32 %v581_v9, 0.0  ;;  %v6006_v13 = vpop.f32.mrb[10].mxu0  ;;  %v7183_v18 = vld [vmem:[#allocation2 + $0x51] sm:$0xff] }
  0xfc   : > { %782 = vst.msk [vmem:[#allocation2 + $0x81] sm:$0xff] %vm373_vm1, %v708_v11  ;;  %v596_v14 = vadd.f32 %v6006_v13, %v7129_v41  ;;  %v590_v15 = vpop.f32.mrb[11].mxu0  ;;  %v7175_v16 = vld [vmem:[#allocation2 + $0x49] sm:$0xff] }
  0xfd   : > { %781 = vst.msk [vmem:[#allocation2 + $0x79] sm:$0xff] %vm373_vm1, %v707_v12  ;;  %v591_v17 = vadd.f32 %v7129_v41, %v590_v15  ;;  %6048 = vmatprep.mubr.msk.f32.mxu1 %vm373_vm1, %v7175_v16  ;;  %6195 = vmatprep.mubr.msk.f32.mxu0 %vm373_vm1, %v7175_v16 }
  0xfe   : > { %v710_v19 = vmax.f32 %v596_v14, 0.0  ;;  %6049 = vmatmul.mubr.msk.f32.gmra.mrb[6].mxu1 %vm373_vm1, %v7183_v18  ;;  %6196 = vmatmul.mubr.msk.f32.gmra.mrb[36].mxu0 %vm373_vm1, %v7183_v18 }
  0xff   : > { %v709_v20 = vmax.f32 %v591_v17, 0.0  ;;  %v6009_v21 = vpop.f32.mrb[12].mxu0  ;;  %v7199_v26 = vld [vmem:[#allocation2 + $0x69] sm:$0xff] }
 0x100   : > { %784 = vst.msk [vmem:[#allocation2 + $0x99] sm:$0xff] %vm373_vm1, %v710_v19  ;;  %v606_v22 = vadd.f32 %v6009_v21, %v7129_v41  ;;  %v600_v23 = vpop.f32.mrb[13].mxu0  ;;  %v7191_v24 = vld [vmem:[#allocation2 + $0x61] sm:$0xff] }
 0x101   : > { %783 = vst.msk [vmem:[#allocation2 + $0x91] sm:$0xff] %vm373_vm1, %v709_v20  ;;  %v601_v25 = vadd.f32 %v7129_v41, %v600_v23  ;;  %6051 = vmatprep.mubr.msk.f32.mxu1 %vm373_vm1, %v7191_v24  ;;  %6198 = vmatprep.mubr.msk.f32.mxu0 %vm373_vm1, %v7191_v24 }
 0x102   : > { %v712_v27 = vmax.f32 %v606_v22, 0.0  ;;  %6052 = vmatmul.mubr.msk.f32.gmra.mrb[8].mxu1 %vm373_vm1, %v7199_v26  ;;  %6199 = vmatmul.mubr.msk.f32.gmra.mrb[38].mxu0 %vm373_vm1, %v7199_v26 }
 0x103   : > { %v711_v28 = vmax.f32 %v601_v25, 0.0  ;;  %v6012_v29 = vpop.f32.mrb[14].mxu0  ;;  %v7215_v34 = vld [vmem:[#allocation2 + $0x81] sm:$0xff] }
 0x104   : > { %786 = vst.msk [vmem:[#allocation2 + $0xb1] sm:$0xff] %vm373_vm1, %v712_v27  ;;  %v616_v30 = vadd.f32 %v6012_v29, %v7129_v41  ;;  %v610_v31 = vpop.f32.mrb[15].mxu0  ;;  %v7207_v32 = vld [vmem:[#allocation2 + $0x79] sm:$0xff] }
 0x105   : > { %785 = vst.msk [vmem:[#allocation2 + $0xa9] sm:$0xff] %vm373_vm1, %v711_v28  ;;  %v611_v33 = vadd.f32 %v7129_v41, %v610_v31  ;;  %6054 = vmatprep.mubr.msk.f32.mxu1 %vm373_vm1, %v7207_v32  ;;  %6201 = vmatprep.mubr.msk.f32.mxu0 %vm373_vm1, %v7207_v32 }
 0x106   : > { %v714_v35 = vmax.f32 %v616_v30, 0.0  ;;  %6055 = vmatmul.mubr.msk.f32.gmra.mrb[10].mxu1 %vm373_vm1, %v7215_v34  ;;  %6202 = vmatmul.mubr.msk.f32.gmra.mrb[40].mxu0 %vm373_vm1, %v7215_v34 }
 0x107   : > { %v713_v36 = vmax.f32 %v611_v33, 0.0  ;;  %v6015_v37 = vpop.f32.mrb[16].mxu0  ;;  %v7231_v44 = vld [vmem:[#allocation2 + $0x99] sm:$0xff] }
 0x108   : > { %788 = vst.msk [vmem:[#allocation2 + $0xc9] sm:$0xff] %vm373_vm1, %v714_v35  ;;  %v626_v38 = vadd.f32 %v6015_v37, %v7129_v41  ;;  %v620_v40 = vpop.f32.mrb[17].mxu0  ;;  %v7223_v42 = vld [vmem:[#allocation2 + $0x91] sm:$0xff] }
 0x109   : > { %787 = vst.msk [vmem:[#allocation2 + $0xc1] sm:$0xff] %vm373_vm1, %v713_v36  ;;  %v621_v43 = vadd.f32 %v7129_v41, %v620_v40  ;;  %6057 = vmatprep.mubr.msk.f32.mxu1 %vm373_vm1, %v7223_v42  ;;  %6204 = vmatprep.mubr.msk.f32.mxu0 %vm373_vm1, %v7223_v42 }
 0x10a   : > { %v716_v45 = vmax.f32 %v626_v38, 0.0  ;;  %6058 = vmatmul.mubr.msk.f32.gmra.mrb[12].mxu1 %vm373_vm1, %v7231_v44  ;;  %6205 = vmatmul.mubr.msk.f32.gmra.mrb[42].mxu0 %vm373_vm1, %v7231_v44 }
 0x10b   : > { %v715_v46 = vmax.f32 %v621_v43, 0.0  ;;  %v6018_v47 = vpop.f32.mrb[18].mxu0  ;;  %v7247_v52 = vld [vmem:[#allocation2 + $0xb1] sm:$0xff] }
 0x10c   : > { %790 = vst.msk [vmem:[#allocation2 + $0xe1] sm:$0xff] %vm373_vm1, %v716_v45  ;;  %v636_v48 = vadd.f32 %v6018_v47, %v7129_v41  ;;  %v630_v49 = vpop.f32.mrb[19].mxu0  ;;  %v7239_v50 = vld [vmem:[#allocation2 + $0xa9] sm:$0xff] }
 0x10d   : > { %789 = vst.msk [vmem:[#allocation2 + $0xd9] sm:$0xff] %vm373_vm1, %v715_v46  ;;  %v631_v51 = vadd.f32 %v7129_v41, %v630_v49  ;;  %6060 = vmatprep.mubr.msk.f32.mxu1 %vm373_vm1, %v7239_v50  ;;  %6207 = vmatprep.mubr.msk.f32.mxu0 %vm373_vm1, %v7239_v50 }
 0x10e   : > { %v718_v53 = vmax.f32 %v636_v48, 0.0  ;;  %6061 = vmatmul.mubr.msk.f32.gmra.mrb[14].mxu1 %vm373_vm1, %v7247_v52  ;;  %6208 = vmatmul.mubr.msk.f32.gmra.mrb[44].mxu0 %vm373_vm1, %v7247_v52 }
 0x10f   : > { %v717_v54 = vmax.f32 %v631_v51, 0.0  ;;  %v6021_v55 = vpop.f32.mrb[20].mxu0  ;;  %v7263_v60 = vld [vmem:[#allocation2 + $0xc9] sm:$0xff] }
 0x110   : > { %792 = vst.msk [vmem:[#allocation2 + $0xf9] sm:$0xff] %vm373_vm1, %v718_v53  ;;  %v646_v56 = vadd.f32 %v6021_v55, %v7129_v41  ;;  %v640_v57 = vpop.f32.mrb[21].mxu0  ;;  %v7255_v58 = vld [vmem:[#allocation2 + $0xc1] sm:$0xff] }
 0x111   : > { %791 = vst.msk [vmem:[#allocation2 + $0xf1] sm:$0xff] %vm373_vm1, %v717_v54  ;;  %v641_v59 = vadd.f32 %v7129_v41, %v640_v57  ;;  %6063 = vmatprep.mubr.msk.f32.mxu1 %vm373_vm1, %v7255_v58  ;;  %6210 = vmatprep.mubr.msk.f32.mxu0 %vm373_vm1, %v7255_v58 }
 0x112   : > { %v720_v61 = vmax.f32 %v646_v56, 0.0  ;;  %6064 = vmatmul.mubr.msk.f32.gmra.mrb[16].mxu1 %vm373_vm1, %v7263_v60  ;;  %6211 = vmatmul.mubr.msk.f32.gmra.mrb[46].mxu0 %vm373_vm1, %v7263_v60  ;;  %v805_v56 = vld [vmem:[#allocation2] sm:$0xff] }
 0x113   : > { %v719_v62 = vmax.f32 %v641_v59, 0.0  ;;  %v6024_v63 = vpop.f32.mrb[22].mxu0  ;;  %v7279_v5 = vld [vmem:[#allocation2 + $0xe1] sm:$0xff] }
 0x114   : > { %794 = vst.msk [vmem:[#allocation2 + $0x111] sm:$0xff] %vm373_vm1, %v720_v61  ;;  %v656_v0 = vadd.f32 %v6024_v63, %v7129_v41  ;;  %v650_v1 = vpop.f32.mrb[23].mxu0  ;;  %v7271_v3 = vld [vmem:[#allocation2 + $0xd9] sm:$0xff]  ;;  %v806_v59 = vld [vmem:[#allocation2 + $0x8] sm:$0xff] }
 0x115   : > { %793 = vst.msk [vmem:[#allocation2 + $0x109] sm:$0xff] %vm373_vm1, %v719_v62  ;;  %v651_v4 = vadd.f32 %v7129_v41, %v650_v1  ;;  %6066 = vmatprep.mubr.msk.f32.mxu1 %vm373_vm1, %v7271_v3  ;;  %6213 = vmatprep.mubr.msk.f32.mxu0 %vm373_vm1, %v7271_v3  ;;  %v7385_v63 = vld [vmem:[%s8314_s3 + $0x1c] sm:$0xf]  ;;  %v808_v1 = vld [vmem:[#allocation2 + $0x20] sm:$0xff] }
 0x116   : > { %v722_v6 = vmax.f32 %v656_v0, 0.0  ;;  %6067 = vmatmul.mubr.msk.f32.gmra.mrb[18].mxu1 %vm373_vm1, %v7279_v5  ;;  %6214 = vmatmul.mubr.msk.f32.gmra.mrb[48].mxu0 %vm373_vm1, %v7279_v5  ;;  %v807_v0 = vld [vmem:[#allocation2 + $0x18] sm:$0xff] }
 0x117   : > { %v721_v7 = vmax.f32 %v651_v4, 0.0  ;;  %v6027_v9 = vpop.f32.mrb[24].mxu0  ;;  %v7295_v15 = vld [vmem:[#allocation2 + $0xf9] sm:$0xff]  ;;  %v7398_v4 = vld [vmem:[#allocation2 + $0x30] sm:$0xff] }
 0x118   : > { %796 = vst.msk [vmem:[#allocation2 + $0x129] sm:$0xff] %vm373_vm1, %v722_v6  ;;  %v666_v11 = vadd.f32 %v6027_v9, %v7129_v41  ;;  %v660_v12 = vpop.f32.mrb[25].mxu0  ;;  %v7287_v13 = vld [vmem:[#allocation2 + $0xf1] sm:$0xff]  ;;  %v7412_v6 = vld [vmem:[#allocation2 + $0x48] sm:$0xff] }
 0x119   : > { %795 = vst.msk [vmem:[#allocation2 + $0x121] sm:$0xff] %vm373_vm1, %v721_v7  ;;  %v661_v14 = vadd.f32 %v7129_v41, %v660_v12  ;;  %6069 = vmatprep.mubr.msk.f32.mxu1 %vm373_vm1, %v7287_v13  ;;  %6216 = vmatprep.mubr.msk.f32.mxu0 %vm373_vm1, %v7287_v13  ;;  %v7418_v7 = vld [vmem:[#allocation2 + $0x50] sm:$0xff]  ;;  %v7430_v9 = vld [vmem:[#allocation2 + $0x68] sm:$0xff]  ;;  %v7442_v12 = vld [vmem:[#allocation2 + $0x80] sm:$0xff] }
 0x11a   : > { %v724_v17 = vmax.f32 %v666_v11, 0.0  ;;  %6070 = vmatmul.mubr.msk.f32.gmra.mrb[20].mxu1 %vm373_vm1, %v7295_v15  ;;  %6217 = vmatmul.mubr.msk.f32.gmra.mrb[50].mxu0 %vm373_vm1, %v7295_v15  ;;  %v7436_v11 = vld [vmem:[#allocation2 + $0x78] sm:$0xff] }
 0x11b   : > { %v723_v19 = vmax.f32 %v661_v14, 0.0  ;;  %v6030_v20 = vpop.f32.mrb[26].mxu0  ;;  %v7311_v27 = vld [vmem:[#allocation2 + $0x111] sm:$0xff] }
 0x11c   : > { %798 = vst.msk [vmem:[#allocation2 + $0x141] sm:$0xff] %vm373_vm1, %v724_v17  ;;  %v676_v21 = vadd.f32 %v6030_v20, %v7129_v41  ;;  %v670_v22 = vpop.f32.mrb[27].mxu0  ;;  %v7303_v23 = vld [vmem:[#allocation2 + $0x109] sm:$0xff]  ;;  %v7454_v17 = vld [vmem:[#allocation2 + $0x98] sm:$0xff] }
 0x11d   : > { %797 = vst.msk [vmem:[#allocation2 + $0x139] sm:$0xff] %vm373_vm1, %v723_v19  ;;  %v671_v25 = vadd.f32 %v7129_v41, %v670_v22  ;;  %6072 = vmatprep.mubr.msk.f32.mxu1 %vm373_vm1, %v7303_v23  ;;  %6219 = vmatprep.mubr.msk.f32.mxu0 %vm373_vm1, %v7303_v23  ;;  %v7448_v14 = vld [vmem:[#allocation2 + $0x90] sm:$0xff]  ;;  %v7460_v19 = vld [vmem:[#allocation2 + $0xa8] sm:$0xff] }
 0x11e   : > { %v726_v28 = vmax.f32 %v676_v21, 0.0  ;;  %6073 = vmatmul.mubr.msk.f32.gmra.mrb[22].mxu1 %vm373_vm1, %v7311_v27  ;;  %6220 = vmatmul.mubr.msk.f32.gmra.mrb[52].mxu0 %vm373_vm1, %v7311_v27  ;;  %v7466_v20 = vld [vmem:[#allocation2 + $0xb0] sm:$0xff]  ;;  %v7472_v21 = vld [vmem:[#allocation2 + $0xc0] sm:$0xff]  ;;  %v7478_v22 = vld [vmem:[#allocation2 + $0xc8] sm:$0xff] }
 0x11f   : > { %v725_v29 = vmax.f32 %v671_v25, 0.0  ;;  %v6033_v30 = vpop.f32.mrb[28].mxu0  ;;  %v7327_v37 = vld [vmem:[#allocation2 + $0x129] sm:$0xff]  ;;  %v7484_v25 = vld [vmem:[#allocation2 + $0xd8] sm:$0xff] }
 0x120   : > { %800 = vst.msk [vmem:[#allocation2 + $0x159] sm:$0xff] %vm373_vm1, %v726_v28  ;;  %v686_v31 = vadd.f32 %v6033_v30, %v7129_v41  ;;  %v680_v33 = vpop.f32.mrb[29].mxu0  ;;  %v7319_v35 = vld [vmem:[#allocation2 + $0x121] sm:$0xff]  ;;  %v7502_v30 = vld [vmem:[#allocation2 + $0xf8] sm:$0xff] }
 0x121   : > { %799 = vst.msk [vmem:[#allocation2 + $0x151] sm:$0xff] %vm373_vm1, %v725_v29  ;;  %v681_v36 = vadd.f32 %v7129_v41, %v680_v33  ;;  %6075 = vmatprep.mubr.msk.f32.mxu1 %vm373_vm1, %v7319_v35  ;;  %6222 = vmatprep.mubr.msk.f32.mxu0 %vm373_vm1, %v7319_v35  ;;  %v7490_v28 = vld [vmem:[#allocation2 + $0xe0] sm:$0xff]  ;;  %v7496_v29 = vld [vmem:[#allocation2 + $0xf0] sm:$0xff] }
 0x122   : > { %v728_v38 = vmax.f32 %v686_v31, 0.0  ;;  %6076 = vmatmul.mubr.msk.f32.gmra.mrb[24].mxu1 %vm373_vm1, %v7327_v37  ;;  %6223 = vmatmul.mubr.msk.f32.gmra.mrb[54].mxu0 %vm373_vm1, %v7327_v37  ;;  %v7508_v31 = vld [vmem:[#allocation2 + $0x108] sm:$0xff]  ;;  %v7514_v33 = vld [vmem:[#allocation2 + $0x110] sm:$0xff] }
 0x123   : > { %v727_v40 = vmax.f32 %v681_v36, 0.0  ;;  %v6036_v43 = vpop.f32.mrb[30].mxu0  ;;  %v7343_v49 = vld [vmem:[#allocation2 + $0x141] sm:$0xff] }
 0x124   : > { %802 = vst.msk [vmem:[#allocation2 + $0x171] sm:$0xff] %vm373_vm1, %v728_v38  ;;  %v696_v45 = vadd.f32 %v6036_v43, %v7129_v41  ;;  %v690_v46 = vpop.f32.mrb[31].mxu0  ;;  %v7335_v47 = vld [vmem:[#allocation2 + $0x139] sm:$0xff]  ;;  %v7526_v38 = vld [vmem:[#allocation2 + $0x128] sm:$0xff] }
 0x125   : > { %801 = vst.msk [vmem:[#allocation2 + $0x169] sm:$0xff] %vm373_vm1, %v727_v40  ;;  %v691_v48 = vadd.f32 %v7129_v41, %v690_v46  ;;  %6078 = vmatprep.mubr.msk.f32.mxu1 %vm373_vm1, %v7335_v47  ;;  %6225 = vmatprep.mubr.msk.f32.mxu0 %vm373_vm1, %v7335_v47  ;;  %v7520_v36 = vld [vmem:[#allocation2 + $0x120] sm:$0xff]  ;;  %v7532_v40 = vld [vmem:[#allocation2 + $0x138] sm:$0xff] }
 0x126   : > { %v730_v51 = vmax.f32 %v696_v45, 0.0  ;;  %6079 = vmatmul.mubr.msk.f32.gmra.mrb[26].mxu1 %vm373_vm1, %v7343_v49  ;;  %6226 = vmatmul.mubr.msk.f32.gmra.mrb[56].mxu0 %vm373_vm1, %v7343_v49  ;;  %v7538_v43 = vld [vmem:[#allocation2 + $0x140] sm:$0xff] }
 0x127   : > { %v729_v53 = vmax.f32 %v691_v48, 0.0  ;;  %v7357_v41 = vld [vmem:[#allocation2 + $0x159] sm:$0xff] }
 0x128   : > { %804 = vst.msk [vmem:[#allocation2 + $0x189] sm:$0xff] %vm373_vm1, %v730_v51  ;;  %v7350_v54 = vld [vmem:[#allocation2 + $0x151] sm:$0xff]  ;;  %v1520_v51 = vld [vmem:[#allocation2 + $0x2] sm:$0xff] }
 0x129   : > { %803 = vst.msk [vmem:[#allocation2 + $0x181] sm:$0xff] %vm373_vm1, %v729_v53  ;;  %6081 = vmatprep.mubr.msk.f32.mxu1 %vm373_vm1, %v7350_v54  ;;  %6228 = vmatprep.mubr.msk.f32.mxu0 %vm373_vm1, %v7350_v54  ;;  %v7544_v45 = vld [vmem:[#allocation2 + $0x150] sm:$0xff]  ;;  %v7550_v46 = vld [vmem:[#allocation2 + $0x158] sm:$0xff] }
 0x12a   : > { %6082 = vmatmul.mubr.msk.f32.gmra.mrb[28].mxu1 %vm373_vm1, %v7357_v41  ;;  %6229 = vmatmul.mubr.msk.f32.gmra.mrb[58].mxu0 %vm373_vm1, %v7357_v41 }
 0x12b   : > { %v7369_v57 = vld [vmem:[#allocation2 + $0x171] sm:$0xff] }
 0x12c   : > { %v7363_v55 = vld [vmem:[#allocation2 + $0x169] sm:$0xff] }
 0x12d   : > { %6084 = vmatprep.mubr.msk.f32.mxu1 %vm373_vm1, %v7363_v55  ;;  %6231 = vmatprep.mubr.msk.f32.mxu0 %vm373_vm1, %v7363_v55  ;;  %v7556_v48 = vld [vmem:[#allocation2 + $0x168] sm:$0xff] }
 0x12e   : > { %6085 = vmatmul.mubr.msk.f32.gmra.mrb[30].mxu1 %vm373_vm1, %v7369_v57  ;;  %6232 = vmatmul.mubr.msk.f32.gmra.mrb[60].mxu0 %vm373_vm1, %v7369_v57  ;;  %8349 = vst [vmem:[#allocation4_spill] sm:$0xff] %v7556_v48 }
 0x12f   : > { %6089 = vmatprep.mubr.msk.f32.mxu1 %vm373_vm1, %v805_v56  ;;  %v7376_v61 = vld [vmem:[#allocation2 + $0x189] sm:$0xff] }
 0x130   : > { %v7378_v62 = vld [vmem:[#allocation2 + $0x181] sm:$0xff]  ;;  %v7564_v56 = vld [vmem:[#allocation2 + $0x170] sm:$0xff] }
 0x131   : > { %6234 = vmatprep.mubr.msk.f32.mxu0 %vm373_vm1, %v7378_v62  ;;  %v7562_v53 = vld [vmem:[#allocation2 + $0x180] sm:$0xff] }
 0x132   : > { %6090 = vmatmul.mubr.msk.f32.vlgmr.msra.gmra.mrb[0].mxu1 %vm373_vm1, %v806_v59  ;;  %6235 = vmatmul.mubr.msk.f32.gmra.mrb[62].mxu0 %vm373_vm1, %v7376_v61  ;;  %v1521_v59 = vld [vmem:[#allocation2 + $0xa] sm:$0xff] }
 0x133   : > { %6138 = vmatpush3.msk.msra.mxu1 %vm470_vm0, %v7118_v39  ;;  %6092 = vmatprep.mubr.msk.f32.mxu1 %vm373_vm1, %v807_v0  ;;  %v7406_v39 = vld [vmem:[#allocation2 + $0x38] sm:$0xff] }
 0x134   : > { %6239 = vmatprep.mubr.msk.f32.mxu0 %vm373_vm1, %v807_v0  ;;  %6337 = vmatprep.subr.msk.mxu1 %vm470_vm0, %v7385_v63  ;;  %v7573_v0 = vld [vmem:[#allocation2 + $0x188] sm:$0xff] }
 0x135   : > { %8350 = vst [vmem:[#allocation5_spill] sm:$0xff] %v7573_v0 }
 0x136   : > { %6093 = vmatmul.mubr.msk.f32.gmra.mrb[2].mxu1 %vm373_vm1, %v808_v1  ;;  %6240 = vmatmul.mubr.msk.f32.vlgmr.msra.gmra.mrb[32].mxu0 %vm373_vm1, %v808_v1  ;;  %v7578_v1 = vld [vmem:[%s8314_s3 + $0x18] sm:$0xf] }
 0x137   : > { %6095 = vmatprep.mubr.msk.f32.mxu1 %vm373_vm1, %v7398_v4  ;;  %6242 = vmatprep.mubr.msk.f32.mxu0 %vm373_vm1, %v7398_v4 }
 0x138   : > { %6288 = vmatpush3.msk.msra.mxu0 %vm470_vm0, %v7150_v2  ;;  %v7424_v2 = vld [vmem:[#allocation2 + $0x60] sm:$0xff] }
 0x13a   : > { %6096 = vmatmul.mubr.msk.f32.gmra.mrb[4].mxu1 %vm373_vm1, %v7406_v39  ;;  %6243 = vmatmul.mubr.msk.f32.gmra.mrb[34].mxu0 %vm373_vm1, %v7406_v39 }
 0x13b   : > { %6098 = vmatprep.mubr.msk.f32.mxu1 %vm373_vm1, %v7412_v6  ;;  %6245 = vmatprep.mubr.msk.f32.mxu0 %vm373_vm1, %v7412_v6 }
 0x13e   : > { %6099 = vmatmul.mubr.msk.f32.gmra.mrb[6].mxu1 %vm373_vm1, %v7418_v7  ;;  %6246 = vmatmul.mubr.msk.f32.gmra.mrb[36].mxu0 %vm373_vm1, %v7418_v7 }
 0x13f   : > { %6101 = vmatprep.mubr.msk.f32.mxu1 %vm373_vm1, %v7424_v2  ;;  %6248 = vmatprep.mubr.msk.f32.mxu0 %vm373_vm1, %v7424_v2 }
 0x142   : > { %6102 = vmatmul.mubr.msk.f32.gmra.mrb[8].mxu1 %vm373_vm1, %v7430_v9  ;;  %6249 = vmatmul.mubr.msk.f32.gmra.mrb[38].mxu0 %vm373_vm1, %v7430_v9 }
 0x143   : > { %6104 = vmatprep.mubr.msk.f32.mxu1 %vm373_vm1, %v7436_v11  ;;  %6251 = vmatprep.mubr.msk.f32.mxu0 %vm373_vm1, %v7436_v11 }
 0x146   : > { %6105 = vmatmul.mubr.msk.f32.gmra.mrb[10].mxu1 %vm373_vm1, %v7442_v12  ;;  %6252 = vmatmul.mubr.msk.f32.gmra.mrb[40].mxu0 %vm373_vm1, %v7442_v12 }
 0x147   : > { %6107 = vmatprep.mubr.msk.f32.mxu1 %vm373_vm1, %v7448_v14  ;;  %6254 = vmatprep.mubr.msk.f32.mxu0 %vm373_vm1, %v7448_v14 }
 0x14a   : > { %6108 = vmatmul.mubr.msk.f32.gmra.mrb[12].mxu1 %vm373_vm1, %v7454_v17  ;;  %6255 = vmatmul.mubr.msk.f32.gmra.mrb[42].mxu0 %vm373_vm1, %v7454_v17 }
 0x14b   : > { %6110 = vmatprep.mubr.msk.f32.mxu1 %vm373_vm1, %v7460_v19  ;;  %6257 = vmatprep.mubr.msk.f32.mxu0 %vm373_vm1, %v7460_v19 }
 0x14e   : > { %6111 = vmatmul.mubr.msk.f32.gmra.mrb[14].mxu1 %vm373_vm1, %v7466_v20  ;;  %6258 = vmatmul.mubr.msk.f32.gmra.mrb[44].mxu0 %vm373_vm1, %v7466_v20 }
 0x14f   : > { %6113 = vmatprep.mubr.msk.f32.mxu1 %vm373_vm1, %v7472_v21  ;;  %6260 = vmatprep.mubr.msk.f32.mxu0 %vm373_vm1, %v7472_v21 }
 0x152   : > { %6114 = vmatmul.mubr.msk.f32.gmra.mrb[16].mxu1 %vm373_vm1, %v7478_v22  ;;  %6261 = vmatmul.mubr.msk.f32.gmra.mrb[46].mxu0 %vm373_vm1, %v7478_v22 }
 0x153   : > { %6116 = vmatprep.mubr.msk.f32.mxu1 %vm373_vm1, %v7484_v25  ;;  %6263 = vmatprep.mubr.msk.f32.mxu0 %vm373_vm1, %v7484_v25 }
 0x156   : > { %6117 = vmatmul.mubr.msk.f32.gmra.mrb[18].mxu1 %vm373_vm1, %v7490_v28  ;;  %6264 = vmatmul.mubr.msk.f32.gmra.mrb[48].mxu0 %vm373_vm1, %v7490_v28 }
 0x157   : > { %6119 = vmatprep.mubr.msk.f32.mxu1 %vm373_vm1, %v7496_v29  ;;  %6266 = vmatprep.mubr.msk.f32.mxu0 %vm373_vm1, %v7496_v29 }
 0x15a   : > { %6120 = vmatmul.mubr.msk.f32.gmra.mrb[20].mxu1 %vm373_vm1, %v7502_v30  ;;  %6267 = vmatmul.mubr.msk.f32.gmra.mrb[50].mxu0 %vm373_vm1, %v7502_v30 }
 0x15b   : > { %6122 = vmatprep.mubr.msk.f32.mxu1 %vm373_vm1, %v7508_v31  ;;  %6269 = vmatprep.mubr.msk.f32.mxu0 %vm373_vm1, %v7508_v31 }
 0x15e   : > { %6123 = vmatmul.mubr.msk.f32.gmra.mrb[22].mxu1 %vm373_vm1, %v7514_v33  ;;  %6270 = vmatmul.mubr.msk.f32.gmra.mrb[52].mxu0 %vm373_vm1, %v7514_v33 }
 0x15f   : > { %6125 = vmatprep.mubr.msk.f32.mxu1 %vm373_vm1, %v7520_v36  ;;  %6272 = vmatprep.mubr.msk.f32.mxu0 %vm373_vm1, %v7520_v36 }
 0x162   : > { %6126 = vmatmul.mubr.msk.f32.gmra.mrb[24].mxu1 %vm373_vm1, %v7526_v38  ;;  %6273 = vmatmul.mubr.msk.f32.gmra.mrb[54].mxu0 %vm373_vm1, %v7526_v38 }
 0x163   : > { %6128 = vmatprep.mubr.msk.f32.mxu1 %vm373_vm1, %v7532_v40  ;;  %6275 = vmatprep.mubr.msk.f32.mxu0 %vm373_vm1, %v7532_v40 }
 0x166   : > { %6129 = vmatmul.mubr.msk.f32.gmra.mrb[26].mxu1 %vm373_vm1, %v7538_v43  ;;  %6276 = vmatmul.mubr.msk.f32.gmra.mrb[56].mxu0 %vm373_vm1, %v7538_v43 }
 0x167   : > { %6131 = vmatprep.mubr.msk.f32.mxu1 %vm373_vm1, %v7544_v45  ;;  %6278 = vmatprep.mubr.msk.f32.mxu0 %vm373_vm1, %v7544_v45 }
 0x16a   : > { %6132 = vmatmul.mubr.msk.f32.gmra.mrb[28].mxu1 %vm373_vm1, %v7550_v46  ;;  %6279 = vmatmul.mubr.msk.f32.gmra.mrb[58].mxu0 %vm373_vm1, %v7550_v46 }
 0x16b   : > { %6134 = vmatprep.mubr.msk.f32.mxu1 %vm373_vm1, %v7556_v48  ;;  %6281 = vmatprep.mubr.msk.f32.mxu0 %vm373_vm1, %v7556_v48  ;;  %v1522_v48 = vld [vmem:[#allocation2 + $0x1a] sm:$0xff] }
 0x16e   : > { %6135 = vmatmul.mubr.msk.f32.gmra.mrb[30].mxu1 %vm373_vm1, %v7564_v56  ;;  %6282 = vmatmul.mubr.msk.f32.gmra.mrb[60].mxu0 %vm373_vm1, %v7564_v56 }
 0x16f   : > { %6139 = vmatprep.mubr.msk.f32.mxu1 %vm373_vm1, %v1520_v51  ;;  %6284 = vmatprep.mubr.msk.f32.mxu0 %vm373_vm1, %v7562_v53  ;;  %v1523_v51 = vld [vmem:[#allocation2 + $0x22] sm:$0xff] }
 0x172   : > { %6140 = vmatmul.mubr.msk.f32.vlgmr.msra.gmra.mrb[0].mxu1 %vm373_vm1, %v1521_v59  ;;  %6285 = vmatmul.mubr.msk.f32.gmra.mrb[62].mxu0 %vm373_vm1, %v7573_v0  ;;  %v7591_v59 = vld [vmem:[#allocation2 + $0x32] sm:$0xff] }
 0x173   : > { %6338 = vmatpush3.msk.msra.mxu1 %vm470_vm0, %v7385_v63  ;;  %6142 = vmatprep.mubr.msk.f32.mxu1 %vm373_vm1, %v1522_v48  ;;  %8351 = vst [vmem:[#allocation6_spill] sm:$0xff] %v7591_v59  ;;  %v7597_v63 = vld [vmem:[#allocation2 + $0x3a] sm:$0xff]  ;;  %v7755_v0 = vld [vmem:[#allocation2 + $0x172] sm:$0xff] }
 0x174   : > { %6289 = vmatprep.mubr.msk.f32.mxu0 %vm373_vm1, %v1522_v48  ;;  %6387 = vmatprep.subr.msk.mxu1 %vm470_vm0, %v7578_v1  ;;  %8352 = vst [vmem:[#allocation7_spill] sm:$0xff] %v7597_v63  ;;  %v7603_v48 = vld [vmem:[#allocation2 + $0x4a] sm:$0xff] }
 0x175   : > { %8353 = vst [vmem:[#allocation8_spill] sm:$0xff] %v7603_v48 }
 0x176   : > { %6143 = vmatmul.mubr.msk.f32.gmra.mrb[2].mxu1 %vm373_vm1, %v1523_v51  ;;  %6290 = vmatmul.mubr.msk.f32.vlgmr.msra.gmra.mrb[32].mxu0 %vm373_vm1, %v1523_v51  ;;  %v7609_v51 = vld [vmem:[#allocation2 + $0x52] sm:$0xff] }
 0x177   : > { %6145 = vmatprep.mubr.msk.f32.mxu1 %vm373_vm1, %v7591_v59  ;;  %6292 = vmatprep.mubr.msk.f32.mxu0 %vm373_vm1, %v7591_v59  ;;  %8354 = vst [vmem:[#allocation9_spill] sm:$0xff] %v7609_v51  ;;  %v7615_v59 = vld [vmem:[#allocation2 + $0x62] sm:$0xff] }
 0x178   : > { %8355 = vst [vmem:[#allocation10_spill] sm:$0xff] %v7615_v59 }
 0x17a   : > { %6146 = vmatmul.mubr.msk.f32.gmra.mrb[4].mxu1 %vm373_vm1, %v7597_v63  ;;  %6293 = vmatmul.mubr.msk.f32.gmra.mrb[34].mxu0 %vm373_vm1, %v7597_v63  ;;  %v7621_v63 = vld [vmem:[#allocation2 + $0x6a] sm:$0xff] }
 0x17b   : > { %6148 = vmatprep.mubr.msk.f32.mxu1 %vm373_vm1, %v7603_v48  ;;  %6295 = vmatprep.mubr.msk.f32.mxu0 %vm373_vm1, %v7603_v48  ;;  %8356 = vst [vmem:[#allocation11_spill] sm:$0xff] %v7621_v63  ;;  %v7627_v48 = vld [vmem:[#allocation2 + $0x7a] sm:$0xff] }
 0x17c   : > { %8357 = vst [vmem:[#allocation12_spill] sm:$0xff] %v7627_v48 }
 0x17e   : > { %6149 = vmatmul.mubr.msk.f32.gmra.mrb[6].mxu1 %vm373_vm1, %v7609_v51  ;;  %6296 = vmatmul.mubr.msk.f32.gmra.mrb[36].mxu0 %vm373_vm1, %v7609_v51  ;;  %v7633_v51 = vld [vmem:[#allocation2 + $0x82] sm:$0xff] }
 0x17f   : > { %6151 = vmatprep.mubr.msk.f32.mxu1 %vm373_vm1, %v7615_v59  ;;  %6298 = vmatprep.mubr.msk.f32.mxu0 %vm373_vm1, %v7615_v59  ;;  %8358 = vst [vmem:[#allocation13_spill] sm:$0xff] %v7633_v51  ;;  %v7639_v59 = vld [vmem:[#allocation2 + $0x92] sm:$0xff] }
 0x180   : > { %8359 = vst [vmem:[#allocation14_spill] sm:$0xff] %v7639_v59 }
 0x182   : > { %6152 = vmatmul.mubr.msk.f32.gmra.mrb[8].mxu1 %vm373_vm1, %v7621_v63  ;;  %6299 = vmatmul.mubr.msk.f32.gmra.mrb[38].mxu0 %vm373_vm1, %v7621_v63  ;;  %v7645_v63 = vld [vmem:[#allocation2 + $0x9a] sm:$0xff] }
 0x183   : > { %6154 = vmatprep.mubr.msk.f32.mxu1 %vm373_vm1, %v7627_v48  ;;  %6301 = vmatprep.mubr.msk.f32.mxu0 %vm373_vm1, %v7627_v48  ;;  %8360 = vst [vmem:[#allocation15_spill] sm:$0xff] %v7645_v63  ;;  %v7651_v48 = vld [vmem:[#allocation2 + $0xaa] sm:$0xff] }
 0x184   : > { %8361 = vst [vmem:[#allocation16_spill] sm:$0xff] %v7651_v48 }
 0x186   : > { %6155 = vmatmul.mubr.msk.f32.gmra.mrb[10].mxu1 %vm373_vm1, %v7633_v51  ;;  %6302 = vmatmul.mubr.msk.f32.gmra.mrb[40].mxu0 %vm373_vm1, %v7633_v51  ;;  %v7657_v51 = vld [vmem:[#allocation2 + $0xb2] sm:$0xff] }
 0x187   : > { %6157 = vmatprep.mubr.msk.f32.mxu1 %vm373_vm1, %v7639_v59  ;;  %6304 = vmatprep.mubr.msk.f32.mxu0 %vm373_vm1, %v7639_v59  ;;  %8362 = vst [vmem:[#allocation17_spill] sm:$0xff] %v7657_v51  ;;  %v7663_v59 = vld [vmem:[#allocation2 + $0xc2] sm:$0xff] }
 0x188   : > { %8363 = vst [vmem:[#allocation18_spill] sm:$0xff] %v7663_v59 }
 0x18a   : > { %6158 = vmatmul.mubr.msk.f32.gmra.mrb[12].mxu1 %vm373_vm1, %v7645_v63  ;;  %6305 = vmatmul.mubr.msk.f32.gmra.mrb[42].mxu0 %vm373_vm1, %v7645_v63  ;;  %v7669_v63 = vld [vmem:[#allocation2 + $0xca] sm:$0xff] }
 0x18b   : > { %6160 = vmatprep.mubr.msk.f32.mxu1 %vm373_vm1, %v7651_v48  ;;  %6307 = vmatprep.mubr.msk.f32.mxu0 %vm373_vm1, %v7651_v48  ;;  %8364 = vst [vmem:[#allocation19_spill] sm:$0xff] %v7669_v63  ;;  %v7675_v48 = vld [vmem:[#allocation2 + $0xda] sm:$0xff] }
 0x18c   : > { %8365 = vst [vmem:[#allocation20_spill] sm:$0xff] %v7675_v48 }
 0x18e   : > { %6161 = vmatmul.mubr.msk.f32.gmra.mrb[14].mxu1 %vm373_vm1, %v7657_v51  ;;  %6308 = vmatmul.mubr.msk.f32.gmra.mrb[44].mxu0 %vm373_vm1, %v7657_v51  ;;  %v7681_v51 = vld [vmem:[#allocation2 + $0xe2] sm:$0xff] }
 0x18f   : > { %6163 = vmatprep.mubr.msk.f32.mxu1 %vm373_vm1, %v7663_v59  ;;  %6310 = vmatprep.mubr.msk.f32.mxu0 %vm373_vm1, %v7663_v59  ;;  %8366 = vst [vmem:[#allocation21_spill] sm:$0xff] %v7681_v51  ;;  %v7687_v59 = vld [vmem:[#allocation2 + $0xf2] sm:$0xff] }
 0x190   : > { %8367 = vst [vmem:[#allocation22_spill] sm:$0xff] %v7687_v59 }
 0x192   : > { %6164 = vmatmul.mubr.msk.f32.gmra.mrb[16].mxu1 %vm373_vm1, %v7669_v63  ;;  %6311 = vmatmul.mubr.msk.f32.gmra.mrb[46].mxu0 %vm373_vm1, %v7669_v63  ;;  %v7693_v63 = vld [vmem:[#allocation2 + $0xfa] sm:$0xff] }
 0x193   : > { %6166 = vmatprep.mubr.msk.f32.mxu1 %vm373_vm1, %v7675_v48  ;;  %6313 = vmatprep.mubr.msk.f32.mxu0 %vm373_vm1, %v7675_v48  ;;  %8368 = vst [vmem:[#allocation23_spill] sm:$0xff] %v7693_v63  ;;  %v7699_v48 = vld [vmem:[#allocation2 + $0x10a] sm:$0xff] }
 0x194   : > { %8369 = vst [vmem:[#allocation24_spill] sm:$0xff] %v7699_v48 }
 0x196   : > { %6167 = vmatmul.mubr.msk.f32.gmra.mrb[18].mxu1 %vm373_vm1, %v7681_v51  ;;  %6314 = vmatmul.mubr.msk.f32.gmra.mrb[48].mxu0 %vm373_vm1, %v7681_v51  ;;  %v7705_v51 = vld [vmem:[#allocation2 + $0x112] sm:$0xff] }
 0x197   : > { %6169 = vmatprep.mubr.msk.f32.mxu1 %vm373_vm1, %v7687_v59  ;;  %6316 = vmatprep.mubr.msk.f32.mxu0 %vm373_vm1, %v7687_v59  ;;  %8370 = vst [vmem:[#allocation25_spill] sm:$0xff] %v7705_v51  ;;  %v7711_v59 = vld [vmem:[#allocation2 + $0x122] sm:$0xff] }
 0x198   : > { %8371 = vst [vmem:[#allocation26_spill] sm:$0xff] %v7711_v59 }
 0x19a   : > { %6170 = vmatmul.mubr.msk.f32.gmra.mrb[20].mxu1 %vm373_vm1, %v7693_v63  ;;  %6317 = vmatmul.mubr.msk.f32.gmra.mrb[50].mxu0 %vm373_vm1, %v7693_v63  ;;  %v7717_v63 = vld [vmem:[#allocation2 + $0x12a] sm:$0xff] }
 0x19b   : > { %6172 = vmatprep.mubr.msk.f32.mxu1 %vm373_vm1, %v7699_v48  ;;  %6319 = vmatprep.mubr.msk.f32.mxu0 %vm373_vm1, %v7699_v48  ;;  %8372 = vst [vmem:[#allocation27_spill] sm:$0xff] %v7717_v63  ;;  %v7723_v48 = vld [vmem:[#allocation2 + $0x13a] sm:$0xff] }
 0x19c   : > { %8373 = vst [vmem:[#allocation28_spill] sm:$0xff] %v7723_v48 }
 0x19e   : > { %6173 = vmatmul.mubr.msk.f32.gmra.mrb[22].mxu1 %vm373_vm1, %v7705_v51  ;;  %6320 = vmatmul.mubr.msk.f32.gmra.mrb[52].mxu0 %vm373_vm1, %v7705_v51  ;;  %v7729_v51 = vld [vmem:[#allocation2 + $0x142] sm:$0xff] }
 0x19f   : > { %6175 = vmatprep.mubr.msk.f32.mxu1 %vm373_vm1, %v7711_v59  ;;  %6322 = vmatprep.mubr.msk.f32.mxu0 %vm373_vm1, %v7711_v59  ;;  %8374 = vst [vmem:[#allocation29_spill] sm:$0xff] %v7729_v51  ;;  %v7735_v59 = vld [vmem:[#allocation2 + $0x152] sm:$0xff] }
 0x1a2   : > { %6176 = vmatmul.mubr.msk.f32.gmra.mrb[24].mxu1 %vm373_vm1, %v7717_v63  ;;  %6323 = vmatmul.mubr.msk.f32.gmra.mrb[54].mxu0 %vm373_vm1, %v7717_v63  ;;  %v7741_v63 = vld [vmem:[#allocation2 + $0x15a] sm:$0xff] }
 0x1a3   : > { %6178 = vmatprep.mubr.msk.f32.mxu1 %vm373_vm1, %v7723_v48  ;;  %6325 = vmatprep.mubr.msk.f32.mxu0 %vm373_vm1, %v7723_v48  ;;  %8375 = vst [vmem:[#allocation30_spill] sm:$0xff] %v7741_v63  ;;  %v7747_v48 = vld [vmem:[#allocation2 + $0x16a] sm:$0xff] }
 0x1a4   : > { %8376 = vst [vmem:[#allocation31_spill] sm:$0xff] %v7747_v48 }
 0x1a6   : > { %6179 = vmatmul.mubr.msk.f32.gmra.mrb[26].mxu1 %vm373_vm1, %v7729_v51  ;;  %6326 = vmatmul.mubr.msk.f32.gmra.mrb[56].mxu0 %vm373_vm1, %v7729_v51  ;;  %v7753_v51 = vld [vmem:[#allocation2 + $0x182] sm:$0xff] }
 0x1a7   : > { %6181 = vmatprep.mubr.msk.f32.mxu1 %vm373_vm1, %v7735_v59  ;;  %6328 = vmatprep.mubr.msk.f32.mxu0 %vm373_vm1, %v7735_v59 }
 0x1aa   : > { %6182 = vmatmul.mubr.msk.f32.gmra.mrb[28].mxu1 %vm373_vm1, %v7741_v63  ;;  %6329 = vmatmul.mubr.msk.f32.gmra.mrb[58].mxu0 %vm373_vm1, %v7741_v63  ;;  %v7765_v63 = vld [vmem:[#allocation2 + $0x18a] sm:$0xff] }
 0x1ab   : > { %6184 = vmatprep.mubr.msk.f32.mxu1 %vm373_vm1, %v7747_v48  ;;  %6331 = vmatprep.mubr.msk.f32.mxu0 %vm373_vm1, %v7747_v48  ;;  %v5484_v48 = vld [vmem:[%s8314_s3 + $0x20] sm:$0xf] }
 0x1ae   : > { %6185 = vmatmul.mubr.msk.f32.gmra.mrb[30].mxu1 %vm373_vm1, %v7755_v0  ;;  %6332 = vmatmul.mubr.msk.f32.gmra.mrb[60].mxu0 %vm373_vm1, %v7755_v0 }
 0x1af   : > { %6339 = vmatprep.mubr.msk.f32.mxu1 %vm373_vm1, %v7157_v8  ;;  %6334 = vmatprep.mubr.msk.f32.mxu0 %vm373_vm1, %v7753_v51  ;;  %v3209_v8 = vld [vmem:[#allocation2 + $0x199] sm:$0xff] }
 0x1b2   : > { %6340 = vmatmul.mubr.msk.f32.vlgmr.msra.gmra.mrb[32].mxu1 %vm373_vm1, %v7167_v10  ;;  %6335 = vmatmul.mubr.msk.f32.gmra.mrb[62].mxu0 %vm373_vm1, %v7765_v63  ;;  %v3210_v10 = vld [vmem:[#allocation2 + $0x1a1] sm:$0xff] }
 0x1b3   : > { %6388 = vmatpush3.msk.msra.mxu1 %vm470_vm0, %v7578_v1  ;;  %6342 = vmatprep.mubr.msk.f32.mxu1 %vm373_vm1, %v7175_v16  ;;  %v4450_v16 = vld [vmem:[%s8316_s5] sm:$0xf] }
 0x1b4   : > { %6437 = vmatprep.subr.msk.mxu1 %vm470_vm0, %v5484_v48  ;;  %6487 = vmatprep.subr.msk.mxu0 %vm470_vm0, %v4450_v16 }
 0x1b5   : > { %6488 = vmatpush3.msk.msra.mxu0 %vm470_vm0, %v4450_v16 }
 0x1b6   : > { %6343 = vmatmul.mubr.msk.f32.gmra.mrb[34].mxu1 %vm373_vm1, %v7183_v18  ;;  %v8377_v18 = vld [vmem:[#allocation4_spill] sm:$0xff] }
 0x1b7   : > { %6345 = vmatprep.mubr.msk.f32.mxu1 %vm373_vm1, %v7191_v24  ;;  %v3175_v24 = vld [vmem:[#allocation2 + $0x198] sm:$0xff] }
 0x1ba   : > { %6346 = vmatmul.mubr.msk.f32.gmra.mrb[36].mxu1 %vm373_vm1, %v7199_v26  ;;  %v8378_v26 = vld [vmem:[#allocation5_spill] sm:$0xff] }
 0x1bb   : > { %6348 = vmatprep.mubr.msk.f32.mxu1 %vm373_vm1, %v7207_v32  ;;  %v3176_v32 = vld [vmem:[#allocation2 + $0x1a0] sm:$0xff] }
 0x1be   : > { %6349 = vmatmul.mubr.msk.f32.gmra.mrb[38].mxu1 %vm373_vm1, %v7215_v34  ;;  %v8379_v34 = vld [vmem:[#allocation6_spill] sm:$0xff] }
 0x1bf   : > { %6351 = vmatprep.mubr.msk.f32.mxu1 %vm373_vm1, %v7223_v42  ;;  %v8380_v42 = vld [vmem:[#allocation7_spill] sm:$0xff] }
 0x1c2   : > { %6352 = vmatmul.mubr.msk.f32.gmra.mrb[40].mxu1 %vm373_vm1, %v7231_v44  ;;  %v8381_v44 = vld [vmem:[#allocation8_spill] sm:$0xff] }
 0x1c3   : > { %6354 = vmatprep.mubr.msk.f32.mxu1 %vm373_vm1, %v7239_v50  ;;  %v8382_v50 = vld [vmem:[#allocation9_spill] sm:$0xff] }
 0x1c6   : > { %6355 = vmatmul.mubr.msk.f32.gmra.mrb[42].mxu1 %vm373_vm1, %v7247_v52  ;;  %v8383_v52 = vld [vmem:[#allocation10_spill] sm:$0xff] }
 0x1c7   : > { %6357 = vmatprep.mubr.msk.f32.mxu1 %vm373_vm1, %v7255_v58  ;;  %v8384_v58 = vld [vmem:[#allocation11_spill] sm:$0xff] }
 0x1ca   : > { %6358 = vmatmul.mubr.msk.f32.gmra.mrb[44].mxu1 %vm373_vm1, %v7263_v60  ;;  %v8385_v60 = vld [vmem:[#allocation12_spill] sm:$0xff] }
 0x1cb   : > { %6360 = vmatprep.mubr.msk.f32.mxu1 %vm373_vm1, %v7271_v3  ;;  %v8386_v3 = vld [vmem:[#allocation13_spill] sm:$0xff] }
 0x1ce   : > { %6361 = vmatmul.mubr.msk.f32.gmra.mrb[46].mxu1 %vm373_vm1, %v7279_v5  ;;  %v8387_v5 = vld [vmem:[#allocation14_spill] sm:$0xff] }
 0x1cf   : > { %6363 = vmatprep.mubr.msk.f32.mxu1 %vm373_vm1, %v7287_v13  ;;  %v8388_v13 = vld [vmem:[#allocation15_spill] sm:$0xff] }
 0x1d2   : > { %6364 = vmatmul.mubr.msk.f32.gmra.mrb[48].mxu1 %vm373_vm1, %v7295_v15  ;;  %v8389_v15 = vld [vmem:[#allocation16_spill] sm:$0xff] }
 0x1d3   : > { %6366 = vmatprep.mubr.msk.f32.mxu1 %vm373_vm1, %v7303_v23 }
 0x1d6   : > { %6367 = vmatmul.mubr.msk.f32.gmra.mrb[50].mxu1 %vm373_vm1, %v7311_v27 }
 0x1d7   : > { %6369 = vmatprep.mubr.msk.f32.mxu1 %vm373_vm1, %v7319_v35  ;;  %v8390_v35 = vld [vmem:[#allocation17_spill] sm:$0xff] }
 0x1da   : > { %6370 = vmatmul.mubr.msk.f32.gmra.mrb[52].mxu1 %vm373_vm1, %v7327_v37  ;;  %v8391_v37 = vld [vmem:[#allocation18_spill] sm:$0xff] }
 0x1db   : > { %6372 = vmatprep.mubr.msk.f32.mxu1 %vm373_vm1, %v7335_v47 }
 0x1de   : > { %6373 = vmatmul.mubr.msk.f32.gmra.mrb[54].mxu1 %vm373_vm1, %v7343_v49 }
 0x1df   : > { %6375 = vmatprep.mubr.msk.f32.mxu1 %vm373_vm1, %v7350_v54 }
 0x1e2   : > { %6376 = vmatmul.mubr.msk.f32.gmra.mrb[56].mxu1 %vm373_vm1, %v7357_v41 }
 0x1e3   : > { %6378 = vmatprep.mubr.msk.f32.mxu1 %vm373_vm1, %v7363_v55  ;;  %v8392_v55 = vld [vmem:[#allocation19_spill] sm:$0xff] }
 0x1e6   : > { %6379 = vmatmul.mubr.msk.f32.gmra.mrb[58].mxu1 %vm373_vm1, %v7369_v57  ;;  %v8393_v57 = vld [vmem:[#allocation20_spill] sm:$0xff] }
 0x1e7   : > { %6381 = vmatprep.mubr.msk.f32.mxu1 %vm373_vm1, %v7378_v62 }
 0x1ea   : > { %6382 = vmatmul.mubr.msk.f32.gmra.mrb[60].mxu1 %vm373_vm1, %v7376_v61 }
 0x1eb   : > { %6384 = vmatprep.mubr.msk.f32.mxu1 %vm373_vm1, %v3209_v8 }
 0x1ee   : > { %6385 = vmatmul.mubr.msk.f32.gmra.mrb[62].mxu1 %vm373_vm1, %v3210_v10 }
 0x1ef   : > { %6389 = vmatprep.mubr.msk.f32.mxu1 %vm373_vm1, %v7398_v4 }
 0x1f2   : > { %6390 = vmatmul.mubr.msk.f32.vlgmr.msra.gmra.mrb[32].mxu1 %vm373_vm1, %v7406_v39 }
 0x1f3   : > { %6438 = vmatpush3.msk.msra.mxu1 %vm470_vm0, %v5484_v48  ;;  %6392 = vmatprep.mubr.msk.f32.mxu1 %vm373_vm1, %v7412_v6 }
 0x1f6   : > { %6393 = vmatmul.mubr.msk.f32.gmra.mrb[34].mxu1 %vm373_vm1, %v7418_v7 }
 0x1f7   : > { %6395 = vmatprep.mubr.msk.f32.mxu1 %vm373_vm1, %v7424_v2 }
 0x1fa   : > { %6396 = vmatmul.mubr.msk.f32.gmra.mrb[36].mxu1 %vm373_vm1, %v7430_v9  ;;  %v8394_v9 = vld [vmem:[#allocation21_spill] sm:$0xff] }
 0x1fb   : > { %6398 = vmatprep.mubr.msk.f32.mxu1 %vm373_vm1, %v7436_v11 }
 0x1fe   : > { %6399 = vmatmul.mubr.msk.f32.gmra.mrb[38].mxu1 %vm373_vm1, %v7442_v12  ;;  %v8395_v12 = vld [vmem:[#allocation22_spill] sm:$0xff] }
 0x1ff   : > { %6401 = vmatprep.mubr.msk.f32.mxu1 %vm373_vm1, %v7448_v14 }
 0x202   : > { %6402 = vmatmul.mubr.msk.f32.gmra.mrb[40].mxu1 %vm373_vm1, %v7454_v17 }
 0x203   : > { %6404 = vmatprep.mubr.msk.f32.mxu1 %vm373_vm1, %v7460_v19 }
 0x206   : > { %6405 = vmatmul.mubr.msk.f32.gmra.mrb[42].mxu1 %vm373_vm1, %v7466_v20 }
 0x207   : > { %6407 = vmatprep.mubr.msk.f32.mxu1 %vm373_vm1, %v7472_v21 }
 0x20a   : > { %6408 = vmatmul.mubr.msk.f32.gmra.mrb[44].mxu1 %vm373_vm1, %v7478_v22 }
 0x20b   : > { %6410 = vmatprep.mubr.msk.f32.mxu1 %vm373_vm1, %v7484_v25 }
 0x20e   : > { %6411 = vmatmul.mubr.msk.f32.gmra.mrb[46].mxu1 %vm373_vm1, %v7490_v28  ;;  %v8396_v28 = vld [vmem:[#allocation23_spill] sm:$0xff] }
 0x20f   : > { %6413 = vmatprep.mubr.msk.f32.mxu1 %vm373_vm1, %v7496_v29 }
 0x212   : > { %6414 = vmatmul.mubr.msk.f32.gmra.mrb[48].mxu1 %vm373_vm1, %v7502_v30  ;;  %v8397_v30 = vld [vmem:[#allocation24_spill] sm:$0xff] }
 0x213   : > { %6416 = vmatprep.mubr.msk.f32.mxu1 %vm373_vm1, %v7508_v31 }
 0x216   : > { %6417 = vmatmul.mubr.msk.f32.gmra.mrb[50].mxu1 %vm373_vm1, %v7514_v33 }
 0x217   : > { %6419 = vmatprep.mubr.msk.f32.mxu1 %vm373_vm1, %v7520_v36 }
 0x21a   : > { %6420 = vmatmul.mubr.msk.f32.gmra.mrb[52].mxu1 %vm373_vm1, %v7526_v38 }
 0x21b   : > { %6422 = vmatprep.mubr.msk.f32.mxu1 %vm373_vm1, %v7532_v40 }
 0x21e   : > { %6423 = vmatmul.mubr.msk.f32.gmra.mrb[54].mxu1 %vm373_vm1, %v7538_v43 }
 0x21f   : > { %6425 = vmatprep.mubr.msk.f32.mxu1 %vm373_vm1, %v7544_v45 }
 0x222   : > { %6426 = vmatmul.mubr.msk.f32.gmra.mrb[56].mxu1 %vm373_vm1, %v7550_v46  ;;  %v8398_v46 = vld [vmem:[#allocation25_spill] sm:$0xff] }
 0x223   : > { %6428 = vmatprep.mubr.msk.f32.mxu1 %vm373_vm1, %v8377_v18 }
 0x226   : > { %6429 = vmatmul.mubr.msk.f32.gmra.mrb[58].mxu1 %vm373_vm1, %v7564_v56  ;;  %v8399_v56 = vld [vmem:[#allocation26_spill] sm:$0xff] }
 0x227   : > { %6431 = vmatprep.mubr.msk.f32.mxu1 %vm373_vm1, %v7562_v53 }
 0x22a   : > { %6432 = vmatmul.mubr.msk.f32.gmra.mrb[60].mxu1 %vm373_vm1, %v8378_v26  ;;  %v8400_v26 = vld [vmem:[#allocation27_spill] sm:$0xff] }
 0x22b   : > { %6434 = vmatprep.mubr.msk.f32.mxu1 %vm373_vm1, %v3175_v24 }
 0x22e   : > { %6435 = vmatmul.mubr.msk.f32.gmra.mrb[62].mxu1 %vm373_vm1, %v3176_v32 }
 0x22f   : > { %6439 = vmatprep.mubr.msk.f32.mxu1 %vm373_vm1, %v8379_v34  ;;  %v8401_v34 = vld [vmem:[#allocation28_spill] sm:$0xff] }
 0x232   : > { %6440 = vmatmul.mubr.msk.f32.vlgmr.msra.gmra.mrb[32].mxu1 %vm373_vm1, %v8380_v42 }
 0x233   : > { %6442 = vmatprep.mubr.msk.f32.mxu1 %vm373_vm1, %v8381_v44 }
 0x236   : > { %6443 = vmatmul.mubr.msk.f32.gmra.mrb[34].mxu1 %vm373_vm1, %v8382_v50 }
 0x237   : > { %6445 = vmatprep.mubr.msk.f32.mxu1 %vm373_vm1, %v8383_v52 }
 0x23a   : > { %6446 = vmatmul.mubr.msk.f32.gmra.mrb[36].mxu1 %vm373_vm1, %v8384_v58 }
 0x23b   : > { %6448 = vmatprep.mubr.msk.f32.mxu1 %vm373_vm1, %v8385_v60 }
 0x23e   : > { %6449 = vmatmul.mubr.msk.f32.gmra.mrb[38].mxu1 %vm373_vm1, %v8386_v3 }
 0x23f   : > { %6451 = vmatprep.mubr.msk.f32.mxu1 %vm373_vm1, %v8387_v5  ;;  %v8402_v5 = vld [vmem:[#allocation29_spill] sm:$0xff] }
 0x242   : > { %6452 = vmatmul.mubr.msk.f32.gmra.mrb[40].mxu1 %vm373_vm1, %v8388_v13 }
 0x243   : > { %6454 = vmatprep.mubr.msk.f32.mxu1 %vm373_vm1, %v8389_v15 }
 0x245   : > { %v6141_v23 = vpop.f32.mrb[0].mxu1 }
 0x246   : > { %1911 = vst.msk [vmem:[#allocation3 + $0x8] sm:$0xff] %vm373_vm1, %v6141_v23  ;;  %v1719_v27 = vpop.f32.mrb[1].mxu1  ;;  %6455 = vmatmul.mubr.msk.f32.gmra.mrb[42].mxu1 %vm373_vm1, %v8390_v35 }
 0x247   : > { %1910 = vst.msk [vmem:[#allocation3] sm:$0xff] %vm373_vm1, %v1719_v27  ;;  %6457 = vmatprep.mubr.msk.f32.mxu1 %vm373_vm1, %v8391_v37 }
 0x249   : > { %v6144_v47 = vpop.f32.mrb[2].mxu1  ;;  %v6291_v49 = vpop.f32.mrb[32].mxu0 }
 0x24a   : > { %1913 = vst.msk [vmem:[#allocation3 + $0x18] sm:$0xff] %vm373_vm1, %v6144_v47  ;;  %v1729_v54 = vpop.f32.mrb[3].mxu1  ;;  %v2857_v41 = vpop.f32.mrb[33].mxu0  ;;  %6458 = vmatmul.mubr.msk.f32.gmra.mrb[44].mxu1 %vm373_vm1, %v8392_v55 }
 0x24b   : > { %1912 = vst.msk [vmem:[#allocation3 + $0x10] sm:$0xff] %vm373_vm1, %v1729_v54  ;;  %6460 = vmatprep.mubr.msk.f32.mxu1 %vm373_vm1, %v8393_v57  ;;  %v8403_v54 = vld [vmem:[#allocation30_spill] sm:$0xff] }
 0x24d   : > { %v3049_v61 = vld [vmem:[#allocation3 + $0x8] sm:$0xff]  ;;  %v6147_v62 = vpop.f32.mrb[4].mxu1  ;;  %v6294_v4 = vpop.f32.mrb[34].mxu0 }
 0x24e   : > { %v3081_v39 = vadd.f32 %v6291_v49, %v3049_v61  ;;  %v3048_v6 = vld [vmem:[#allocation3] sm:$0xff]  ;;  %1915 = vst.msk [vmem:[#allocation3 + $0x28] sm:$0xff] %vm373_vm1, %v6147_v62  ;;  %v1739_v7 = vpop.f32.mrb[5].mxu1  ;;  %v2867_v2 = vpop.f32.mrb[35].mxu0  ;;  %6461 = vmatmul.mubr.msk.f32.gmra.mrb[46].mxu1 %vm373_vm1, %v8394_v9 }
 0x24f   : > { %v3080_v11 = vadd.f32 %v3048_v6, %v2857_v41  ;;  %1914 = vst.msk [vmem:[#allocation3 + $0x20] sm:$0xff] %vm373_vm1, %v1739_v7  ;;  %6463 = vmatprep.mubr.msk.f32.mxu1 %vm373_vm1, %v8395_v12 }
 0x250   : > { %3113 = vst.msk [vmem:[#allocation3 + $0x8] sm:$0xff] %vm373_vm1, %v3081_v39 }
 0x251   : > { %3112 = vst.msk [vmem:[#allocation3] sm:$0xff] %vm373_vm1, %v3080_v11  ;;  %v3051_v14 = vld [vmem:[#allocation3 + $0x18] sm:$0xff]  ;;  %v6150_v17 = vpop.f32.mrb[6].mxu1  ;;  %v6297_v19 = vpop.f32.mrb[36].mxu0 }
 0x252   : > { %v3083_v20 = vadd.f32 %v6294_v4, %v3051_v14  ;;  %v3050_v21 = vld [vmem:[#allocation3 + $0x10] sm:$0xff]  ;;  %1917 = vst.msk [vmem:[#allocation3 + $0x38] sm:$0xff] %vm373_vm1, %v6150_v17  ;;  %v1749_v22 = vpop.f32.mrb[7].mxu1  ;;  %v2877_v25 = vpop.f32.mrb[37].mxu0  ;;  %6464 = vmatmul.mubr.msk.f32.gmra.mrb[48].mxu1 %vm373_vm1, %v8396_v28 }
 0x253   : > { %v3082_v29 = vadd.f32 %v3050_v21, %v2867_v2  ;;  %1916 = vst.msk [vmem:[#allocation3 + $0x30] sm:$0xff] %vm373_vm1, %v1749_v22  ;;  %6466 = vmatprep.mubr.msk.f32.mxu1 %vm373_vm1, %v8397_v30  ;;  %v3891_v2 = vld [vmem:[#allocation2 + $0x19a] sm:$0xff] }
 0x254   : > { %3115 = vst.msk [vmem:[#allocation3 + $0x18] sm:$0xff] %vm373_vm1, %v3083_v20 }
 0x255   : > { %3114 = vst.msk [vmem:[#allocation3 + $0x10] sm:$0xff] %vm373_vm1, %v3082_v29  ;;  %v3053_v31 = vld [vmem:[#allocation3 + $0x28] sm:$0xff]  ;;  %v6153_v33 = vpop.f32.mrb[8].mxu1  ;;  %v6300_v36 = vpop.f32.mrb[38].mxu0 }
 0x256   : > { %v3085_v38 = vadd.f32 %v6297_v19, %v3053_v31  ;;  %v3052_v40 = vld [vmem:[#allocation3 + $0x20] sm:$0xff]  ;;  %1919 = vst.msk [vmem:[#allocation3 + $0x48] sm:$0xff] %vm373_vm1, %v6153_v33  ;;  %v1759_v43 = vpop.f32.mrb[9].mxu1  ;;  %v2887_v45 = vpop.f32.mrb[39].mxu0  ;;  %6467 = vmatmul.mubr.msk.f32.gmra.mrb[50].mxu1 %vm373_vm1, %v8398_v46 }
 0x257   : > { %v3084_v53 = vadd.f32 %v3052_v40, %v2877_v25  ;;  %1918 = vst.msk [vmem:[#allocation3 + $0x40] sm:$0xff] %vm373_vm1, %v1759_v43  ;;  %6469 = vmatprep.mubr.msk.f32.mxu1 %vm373_vm1, %v8399_v56 }
 0x258   : > { %3117 = vst.msk [vmem:[#allocation3 + $0x28] sm:$0xff] %vm373_vm1, %v3085_v38 }
 0x259   : > { %3116 = vst.msk [vmem:[#allocation3 + $0x20] sm:$0xff] %vm373_vm1, %v3084_v53  ;;  %v3055_v1 = vld [vmem:[#allocation3 + $0x38] sm:$0xff]  ;;  %v6156_v48 = vpop.f32.mrb[10].mxu1  ;;  %v6303_v8 = vpop.f32.mrb[40].mxu0 }
 0x25a   : > { %v3087_v10 = vadd.f32 %v6300_v36, %v3055_v1  ;;  %v3054_v16 = vld [vmem:[#allocation3 + $0x30] sm:$0xff]  ;;  %1921 = vst.msk [vmem:[#allocation3 + $0x58] sm:$0xff] %vm373_vm1, %v6156_v48  ;;  %v1769_v18 = vpop.f32.mrb[11].mxu1  ;;  %v2897_v24 = vpop.f32.mrb[41].mxu0  ;;  %6470 = vmatmul.mubr.msk.f32.gmra.mrb[52].mxu1 %vm373_vm1, %v8400_v26 }
 0x25b   : > { %v3086_v32 = vadd.f32 %v3054_v16, %v2887_v45  ;;  %1920 = vst.msk [vmem:[#allocation3 + $0x50] sm:$0xff] %vm373_vm1, %v1769_v18  ;;  %6472 = vmatprep.mubr.msk.f32.mxu1 %vm373_vm1, %v8401_v34 }
 0x25c   : > { %3119 = vst.msk [vmem:[#allocation3 + $0x38] sm:$0xff] %vm373_vm1, %v3087_v10 }
 0x25d   : > { %3118 = vst.msk [vmem:[#allocation3 + $0x30] sm:$0xff] %vm373_vm1, %v3086_v32  ;;  %v3057_v42 = vld [vmem:[#allocation3 + $0x48] sm:$0xff]  ;;  %v6159_v44 = vpop.f32.mrb[12].mxu1  ;;  %v6306_v50 = vpop.f32.mrb[42].mxu0 }
 0x25e   : > { %v3089_v52 = vadd.f32 %v6303_v8, %v3057_v42  ;;  %v3056_v58 = vld [vmem:[#allocation3 + $0x40] sm:$0xff]  ;;  %1923 = vst.msk [vmem:[#allocation3 + $0x68] sm:$0xff] %vm373_vm1, %v6159_v44  ;;  %v1779_v60 = vpop.f32.mrb[13].mxu1  ;;  %v2907_v3 = vpop.f32.mrb[43].mxu0  ;;  %6473 = vmatmul.mubr.msk.f32.gmra.mrb[54].mxu1 %vm373_vm1, %v8402_v5 }
 0x25f   : > { %v3088_v13 = vadd.f32 %v3056_v58, %v2897_v24  ;;  %1922 = vst.msk [vmem:[#allocation3 + $0x60] sm:$0xff] %vm373_vm1, %v1779_v60  ;;  %6475 = vmatprep.mubr.msk.f32.mxu1 %vm373_vm1, %v7735_v59  ;;  %v8404_v59 = vld [vmem:[#allocation31_spill] sm:$0xff] }
 0x260   : > { %3121 = vst.msk [vmem:[#allocation3 + $0x48] sm:$0xff] %vm373_vm1, %v3089_v52 }
 0x261   : > { %3120 = vst.msk [vmem:[#allocation3 + $0x40] sm:$0xff] %vm373_vm1, %v3088_v13  ;;  %v3059_v15 = vld [vmem:[#allocation3 + $0x58] sm:$0xff]  ;;  %v6162_v23 = vpop.f32.mrb[14].mxu1  ;;  %v6309_v27 = vpop.f32.mrb[44].mxu0 }
 0x262   : > { %v3091_v35 = vadd.f32 %v6306_v50, %v3059_v15  ;;  %v3058_v37 = vld [vmem:[#allocation3 + $0x50] sm:$0xff]  ;;  %1925 = vst.msk [vmem:[#allocation3 + $0x78] sm:$0xff] %vm373_vm1, %v6162_v23  ;;  %v1789_v47 = vpop.f32.mrb[15].mxu1  ;;  %v2917_v49 = vpop.f32.mrb[45].mxu0  ;;  %6476 = vmatmul.mubr.msk.f32.gmra.mrb[56].mxu1 %vm373_vm1, %v8403_v54 }
 0x263   : > { %v3090_v41 = vadd.f32 %v3058_v37, %v2907_v3  ;;  %1924 = vst.msk [vmem:[#allocation3 + $0x70] sm:$0xff] %vm373_vm1, %v1789_v47  ;;  %6478 = vmatprep.mubr.msk.f32.mxu1 %vm373_vm1, %v8404_v59 }
 0x264   : > { %3123 = vst.msk [vmem:[#allocation3 + $0x58] sm:$0xff] %vm373_vm1, %v3091_v35 }
 0x265   : > { %3122 = vst.msk [vmem:[#allocation3 + $0x50] sm:$0xff] %vm373_vm1, %v3090_v41  ;;  %v3061_v55 = vld [vmem:[#allocation3 + $0x68] sm:$0xff]  ;;  %v6165_v57 = vpop.f32.mrb[16].mxu1  ;;  %v6312_v61 = vpop.f32.mrb[46].mxu0 }
 0x266   : > { %v3093_v62 = vadd.f32 %v6309_v27, %v3061_v55  ;;  %v3060_v4 = vld [vmem:[#allocation3 + $0x60] sm:$0xff]  ;;  %1927 = vst.msk [vmem:[#allocation3 + $0x88] sm:$0xff] %vm373_vm1, %v6165_v57  ;;  %v1799_v39 = vpop.f32.mrb[17].mxu1  ;;  %v2927_v6 = vpop.f32.mrb[47].mxu0  ;;  %6479 = vmatmul.mubr.msk.f32.gmra.mrb[58].mxu1 %vm373_vm1, %v7755_v0 }
 0x267   : > { %v3092_v7 = vadd.f32 %v3060_v4, %v2917_v49  ;;  %1926 = vst.msk [vmem:[#allocation3 + $0x80] sm:$0xff] %vm373_vm1, %v1799_v39  ;;  %6481 = vmatprep.mubr.msk.f32.mxu1 %vm373_vm1, %v7753_v51  ;;  %v3892_v51 = vld [vmem:[#allocation2 + $0x1a2] sm:$0xff] }
 0x268   : > { %3125 = vst.msk [vmem:[#allocation3 + $0x68] sm:$0xff] %vm373_vm1, %v3093_v62 }
 0x269   : > { %3124 = vst.msk [vmem:[#allocation3 + $0x60] sm:$0xff] %vm373_vm1, %v3092_v7  ;;  %v3063_v9 = vld [vmem:[#allocation3 + $0x78] sm:$0xff]  ;;  %v6168_v11 = vpop.f32.mrb[18].mxu1  ;;  %v6315_v12 = vpop.f32.mrb[48].mxu0 }
 0x26a   : > { %v3095_v14 = vadd.f32 %v6312_v61, %v3063_v9  ;;  %v3062_v17 = vld [vmem:[#allocation3 + $0x70] sm:$0xff]  ;;  %1929 = vst.msk [vmem:[#allocation3 + $0x98] sm:$0xff] %vm373_vm1, %v6168_v11  ;;  %v1809_v19 = vpop.f32.mrb[19].mxu1  ;;  %v2937_v0 = vpop.f32.mrb[49].mxu0  ;;  %6482 = vmatmul.mubr.msk.f32.gmra.mrb[60].mxu1 %vm373_vm1, %v7765_v63 }
 0x26b   : > { %v3094_v20 = vadd.f32 %v3062_v17, %v2927_v6  ;;  %1928 = vst.msk [vmem:[#allocation3 + $0x90] sm:$0xff] %vm373_vm1, %v1809_v19  ;;  %6484 = vmatprep.mubr.msk.f32.mxu1 %vm373_vm1, %v3891_v2  ;;  %v4252_v19 = vld [vmem:[#allocation3 + $0x8] sm:$0xff] }
 0x26c   : > { %3127 = vst.msk [vmem:[#allocation3 + $0x78] sm:$0xff] %vm373_vm1, %v3095_v14  ;;  %v4782_v14 = vld [vmem:[%s8318_s7] sm:$0xf] }
 0x26d   : > { %3126 = vst.msk [vmem:[#allocation3 + $0x70] sm:$0xff] %vm373_vm1, %v3094_v20  ;;  %v3065_v21 = vld [vmem:[#allocation3 + $0x88] sm:$0xff]  ;;  %v6171_v22 = vpop.f32.mrb[20].mxu1  ;;  %v6318_v25 = vpop.f32.mrb[50].mxu0  ;;  %6537 = vmatprep.subr.msk.mxu0 %vm470_vm0, %v4782_v14 }
 0x26e   : > { %v3097_v28 = vadd.f32 %v6315_v12, %v3065_v21  ;;  %v3064_v29 = vld [vmem:[#allocation3 + $0x80] sm:$0xff]  ;;  %1931 = vst.msk [vmem:[#allocation3 + $0xa8] sm:$0xff] %vm373_vm1, %v6171_v22  ;;  %v1819_v30 = vpop.f32.mrb[21].mxu1  ;;  %v2947_v31 = vpop.f32.mrb[51].mxu0  ;;  %6485 = vmatmul.mubr.msk.f32.gmra.mrb[62].mxu1 %vm373_vm1, %v3892_v51 }
 0x26f   : > { %v3096_v63 = vadd.f32 %v3064_v29, %v2937_v0  ;;  %1930 = vst.msk [vmem:[#allocation3 + $0xa0] sm:$0xff] %vm373_vm1, %v1819_v30  ;;  %v4251_v51 = vld [vmem:[#allocation3] sm:$0xff]  ;;  %v4253_v30 = vld [vmem:[#allocation3 + $0x10] sm:$0xff] }
 0x270   : > { %3129 = vst.msk [vmem:[#allocation3 + $0x88] sm:$0xff] %vm373_vm1, %v3097_v28 }
 0x271   : > { %3128 = vst.msk [vmem:[#allocation3 + $0x80] sm:$0xff] %vm373_vm1, %v3096_v63  ;;  %v3067_v33 = vld [vmem:[#allocation3 + $0x98] sm:$0xff]  ;;  %v6174_v36 = vpop.f32.mrb[22].mxu1  ;;  %v6321_v38 = vpop.f32.mrb[52].mxu0 }
 0x272   : > { %v3099_v40 = vadd.f32 %v6318_v25, %v3067_v33  ;;  %v3066_v43 = vld [vmem:[#allocation3 + $0x90] sm:$0xff]  ;;  %1933 = vst.msk [vmem:[#allocation3 + $0xb8] sm:$0xff] %vm373_vm1, %v6174_v36  ;;  %v1829_v45 = vpop.f32.mrb[23].mxu1  ;;  %v2957_v46 = vpop.f32.mrb[53].mxu0  ;;  %v4254_v25 = vld [vmem:[#allocation3 + $0x18] sm:$0xff]  ;;  %v4256_v33 = vld [vmem:[#allocation3 + $0x28] sm:$0xff] }
 0x273   : > { %v3098_v53 = vadd.f32 %v3066_v43, %v2947_v31  ;;  %1932 = vst.msk [vmem:[#allocation3 + $0xb0] sm:$0xff] %vm373_vm1, %v1829_v45  ;;  %v8040_v36 = vld [vmem:[%s8315_s4] ss:$0 sm:$0xff]  ;;  %v4255_v43 = vld [vmem:[#allocation3 + $0x20] sm:$0xff] }
 0x274   : > { %3131 = vst.msk [vmem:[#allocation3 + $0x98] sm:$0xff] %vm373_vm1, %v3099_v40 }
 0x275   : > { %3130 = vst.msk [vmem:[#allocation3 + $0x90] sm:$0xff] %vm373_vm1, %v3098_v53  ;;  %v3069_v56 = vld [vmem:[#allocation3 + $0xa8] sm:$0xff]  ;;  %v6177_v1 = vpop.f32.mrb[24].mxu1  ;;  %v6324_v48 = vpop.f32.mrb[54].mxu0 }
 0x276   : > { %v3101_v8 = vadd.f32 %v6321_v38, %v3069_v56  ;;  %v3068_v10 = vld [vmem:[#allocation3 + $0xa0] sm:$0xff]  ;;  %1935 = vst.msk [vmem:[#allocation3 + $0xc8] sm:$0xff] %vm373_vm1, %v6177_v1  ;;  %v1839_v16 = vpop.f32.mrb[25].mxu1  ;;  %v2967_v18 = vpop.f32.mrb[55].mxu0 }
 0x277   : > { %v3100_v24 = vadd.f32 %v3068_v10, %v2957_v46  ;;  %1934 = vst.msk [vmem:[#allocation3 + $0xc0] sm:$0xff] %vm373_vm1, %v1839_v16 }
 0x278   : > { %3133 = vst.msk [vmem:[#allocation3 + $0xa8] sm:$0xff] %vm373_vm1, %v3101_v8 }
 0x279   : > { %3132 = vst.msk [vmem:[#allocation3 + $0xa0] sm:$0xff] %vm373_vm1, %v3100_v24  ;;  %v3071_v26 = vld [vmem:[#allocation3 + $0xb8] sm:$0xff]  ;;  %v6180_v32 = vpop.f32.mrb[26].mxu1  ;;  %v6327_v34 = vpop.f32.mrb[56].mxu0 }
 0x27a   : > { %v3103_v42 = vadd.f32 %v6324_v48, %v3071_v26  ;;  %v3070_v44 = vld [vmem:[#allocation3 + $0xb0] sm:$0xff]  ;;  %1937 = vst.msk [vmem:[#allocation3 + $0xd8] sm:$0xff] %vm373_vm1, %v6180_v32  ;;  %v1849_v50 = vpop.f32.mrb[27].mxu1  ;;  %v2977_v52 = vpop.f32.mrb[57].mxu0  ;;  %v4258_v48 = vld [vmem:[#allocation3 + $0x38] sm:$0xff] }
 0x27b   : > { %v3102_v58 = vadd.f32 %v3070_v44, %v2967_v18  ;;  %1936 = vst.msk [vmem:[#allocation3 + $0xd0] sm:$0xff] %vm373_vm1, %v1849_v50  ;;  %v4257_v18 = vld [vmem:[#allocation3 + $0x30] sm:$0xff] }
 0x27c   : > { %3135 = vst.msk [vmem:[#allocation3 + $0xb8] sm:$0xff] %vm373_vm1, %v3103_v42 }
 0x27d   : > { %3134 = vst.msk [vmem:[#allocation3 + $0xb0] sm:$0xff] %vm373_vm1, %v3102_v58  ;;  %v3073_v60 = vld [vmem:[#allocation3 + $0xc8] sm:$0xff]  ;;  %v6183_v3 = vpop.f32.mrb[28].mxu1  ;;  %v6330_v5 = vpop.f32.mrb[58].mxu0 }
 0x27e   : > { %v3105_v13 = vadd.f32 %v6327_v34, %v3073_v60  ;;  %v3072_v15 = vld [vmem:[#allocation3 + $0xc0] sm:$0xff]  ;;  %1939 = vst.msk [vmem:[#allocation3 + $0xe8] sm:$0xff] %vm373_vm1, %v6183_v3  ;;  %v1859_v23 = vpop.f32.mrb[29].mxu1  ;;  %v2987_v27 = vpop.f32.mrb[59].mxu0 }
 0x27f   : > { %v3104_v35 = vadd.f32 %v3072_v15, %v2977_v52  ;;  %1938 = vst.msk [vmem:[#allocation3 + $0xe0] sm:$0xff] %vm373_vm1, %v1859_v23  ;;  %v4260_v52 = vld [vmem:[#allocation3 + $0x48] sm:$0xff] }
 0x280   : > { %3137 = vst.msk [vmem:[#allocation3 + $0xc8] sm:$0xff] %vm373_vm1, %v3105_v13 }
 0x281   : > { %3136 = vst.msk [vmem:[#allocation3 + $0xc0] sm:$0xff] %vm373_vm1, %v3104_v35  ;;  %v3075_v37 = vld [vmem:[#allocation3 + $0xd8] sm:$0xff]  ;;  %v6186_v47 = vpop.f32.mrb[30].mxu1  ;;  %v6333_v49 = vpop.f32.mrb[60].mxu0 }
 0x282   : > { %v3107_v54 = vadd.f32 %v6330_v5, %v3075_v37  ;;  %v3074_v41 = vld [vmem:[#allocation3 + $0xd0] sm:$0xff]  ;;  %1941 = vst.msk [vmem:[#allocation3 + $0xf8] sm:$0xff] %vm373_vm1, %v6186_v47  ;;  %v1869_v59 = vpop.f32.mrb[31].mxu1  ;;  %v2997_v55 = vpop.f32.mrb[61].mxu0  ;;  %v4259_v5 = vld [vmem:[#allocation3 + $0x40] sm:$0xff] }
 0x283   : > { %v3106_v57 = vadd.f32 %v3074_v41, %v2987_v27  ;;  %1940 = vst.msk [vmem:[#allocation3 + $0xf0] sm:$0xff] %vm373_vm1, %v1869_v59 }
 0x284   : > { %3139 = vst.msk [vmem:[#allocation3 + $0xd8] sm:$0xff] %vm373_vm1, %v3107_v54 }
 0x285   : > { %3138 = vst.msk [vmem:[#allocation3 + $0xd0] sm:$0xff] %vm373_vm1, %v3106_v57  ;;  %v3077_v61 = vld [vmem:[#allocation3 + $0xe8] sm:$0xff]  ;;  %v6336_v62 = vpop.f32.mrb[62].mxu0 }
 0x286   : > { %v3109_v4 = vadd.f32 %v6333_v49, %v3077_v61  ;;  %v3076_v39 = vld [vmem:[#allocation3 + $0xe0] sm:$0xff]  ;;  %v3007_v6 = vpop.f32.mrb[63].mxu0  ;;  %v4262_v49 = vld [vmem:[#allocation3 + $0x58] sm:$0xff] }
 0x287   : > { %v3108_v7 = vadd.f32 %v3076_v39, %v2997_v55  ;;  %v4261_v55 = vld [vmem:[#allocation3 + $0x50] sm:$0xff] }
 0x288   : > { %3141 = vst.msk [vmem:[#allocation3 + $0xe8] sm:$0xff] %vm373_vm1, %v3109_v4 }
 0x289   : > { %3140 = vst.msk [vmem:[#allocation3 + $0xe0] sm:$0xff] %vm373_vm1, %v3108_v7  ;;  %v3079_v2 = vld [vmem:[#allocation3 + $0xf8] sm:$0xff] }
 0x28a   : > { %v3111_v9 = vadd.f32 %v6336_v62, %v3079_v2  ;;  %v3078_v11 = vld [vmem:[#allocation3 + $0xf0] sm:$0xff]  ;;  %v4264_v2 = vld [vmem:[#allocation3 + $0x68] sm:$0xff] }
 0x28b   : > { %v3110_v12 = vadd.f32 %v3078_v11, %v3007_v6 }
 0x28c   : > { %3143 = vst.msk [vmem:[#allocation3 + $0xf8] sm:$0xff] %vm373_vm1, %v3111_v9 }
 0x28d   : > { %3142 = vst.msk [vmem:[#allocation3 + $0xf0] sm:$0xff] %vm373_vm1, %v3110_v12 }
 0x305   : > { %v6441_v17 = vpop.f32.mrb[32].mxu1 }
 0x306   : > { %v4284_v0 = vadd.f32 %v6441_v17, %v4252_v19  ;;  %v4060_v20 = vpop.f32.mrb[33].mxu1 }
 0x307   : > { %v4283_v21 = vadd.f32 %v4251_v51, %v4060_v20 }
 0x308   : > { %4316 = vst.msk [vmem:[#allocation3 + $0x8] sm:$0xff] %vm373_vm1, %v4284_v0 }
 0x309   : > { %4315 = vst.msk [vmem:[#allocation3] sm:$0xff] %vm373_vm1, %v4283_v21  ;;  %v6444_v22 = vpop.f32.mrb[34].mxu1 }
 0x30a   : > { %v4286_v28 = vadd.f32 %v6444_v22, %v4254_v25  ;;  %v4070_v29 = vpop.f32.mrb[35].mxu1  ;;  %v4266_v25 = vld [vmem:[#allocation3 + $0x78] sm:$0xff] }
 0x30b   : > { %v4285_v31 = vadd.f32 %v4253_v30, %v4070_v29 }
 0x30c   : > { %4318 = vst.msk [vmem:[#allocation3 + $0x18] sm:$0xff] %vm373_vm1, %v4286_v28 }
 0x30d   : > { %4317 = vst.msk [vmem:[#allocation3 + $0x10] sm:$0xff] %vm373_vm1, %v4285_v31  ;;  %v6447_v63 = vpop.f32.mrb[36].mxu1  ;;  %v4265_v31 = vld [vmem:[#allocation3 + $0x70] sm:$0xff] }
 0x30e   : > { %v4288_v38 = vadd.f32 %v6447_v63, %v4256_v33  ;;  %v4080_v40 = vpop.f32.mrb[37].mxu1 }
 0x30f   : > { %v4287_v45 = vadd.f32 %v4255_v43, %v4080_v40  ;;  %v4348_v46 = vld [vmem:[#allocation3 + $0x8] sm:$0xff] }
 0x310   : > { %4320 = vst.msk [vmem:[#allocation3 + $0x28] sm:$0xff] %vm373_vm1, %v4288_v38  ;;  %v4347_v53 = vld [vmem:[#allocation3] sm:$0xff]  ;;  %v4387_v56 = vadd.f32 %v8040_v36, %v4348_v46 }
 0x311   : > { %4319 = vst.msk [vmem:[#allocation3 + $0x20] sm:$0xff] %vm373_vm1, %v4287_v45  ;;  %v6450_v1 = vpop.f32.mrb[38].mxu1  ;;  %v4386_v8 = vadd.f32 %v8040_v36, %v4347_v53  ;;  %v4268_v53 = vld [vmem:[#allocation3 + $0x88] sm:$0xff] }
 0x312   : > { %v4290_v10 = vadd.f32 %v6450_v1, %v4258_v48  ;;  %v4090_v16 = vpop.f32.mrb[39].mxu1  ;;  %v4419_v34 = vmax.f32 %v4387_v56, 0.0 }
 0x313   : > { %v4289_v24 = vadd.f32 %v4257_v18, %v4090_v16  ;;  %v4418_v26 = vmax.f32 %v4386_v8, 0.0  ;;  %v4350_v32 = vld [vmem:[#allocation3 + $0x18] sm:$0xff]  ;;  %v4267_v8 = vld [vmem:[#allocation3 + $0x80] sm:$0xff] }
 0x314   : > { %4322 = vst.msk [vmem:[#allocation3 + $0x38] sm:$0xff] %vm373_vm1, %v4290_v10  ;;  %v4349_v42 = vld [vmem:[#allocation3 + $0x10] sm:$0xff]  ;;  %v4389_v44 = vadd.f32 %v8040_v36, %v4350_v32 }
 0x315   : > { %4321 = vst.msk [vmem:[#allocation3 + $0x30] sm:$0xff] %vm373_vm1, %v4289_v24  ;;  %v6453_v50 = vpop.f32.mrb[40].mxu1  ;;  %6489 = vmatprep.mubr.msk.f32.mxu0 %vm373_vm1, %v4418_v26  ;;  %v4388_v58 = vadd.f32 %v8040_v36, %v4349_v42  ;;  %v4270_v42 = vld [vmem:[#allocation3 + $0x98] sm:$0xff] }
 0x316   : > { %v4292_v60 = vadd.f32 %v6453_v50, %v4260_v52  ;;  %v4100_v3 = vpop.f32.mrb[41].mxu1  ;;  %6490 = vmatmul.mubr.msk.f32.vlgmr.msra.gmra.mrb[64].mxu0 %vm373_vm1, %v4419_v34  ;;  %v4421_v27 = vmax.f32 %v4389_v44, 0.0 }
 0x317   : > { %v4291_v13 = vadd.f32 %v4259_v5, %v4100_v3  ;;  %6538 = vmatpush3.msk.msra.mxu0 %vm470_vm0, %v4782_v14  ;;  %v4420_v15 = vmax.f32 %v4388_v58, 0.0  ;;  %v4352_v23 = vld [vmem:[#allocation3 + $0x28] sm:$0xff]  ;;  %v4263_v14 = vld [vmem:[#allocation3 + $0x60] sm:$0xff]  ;;  %v4269_v58 = vld [vmem:[#allocation3 + $0x90] sm:$0xff] }
 0x318   : > { %4324 = vst.msk [vmem:[#allocation3 + $0x48] sm:$0xff] %vm373_vm1, %v4292_v60  ;;  %v4351_v35 = vld [vmem:[#allocation3 + $0x20] sm:$0xff]  ;;  %v4391_v37 = vadd.f32 %v8040_v36, %v4352_v23 }
 0x319   : > { %4323 = vst.msk [vmem:[#allocation3 + $0x40] sm:$0xff] %vm373_vm1, %v4291_v13  ;;  %v6456_v47 = vpop.f32.mrb[42].mxu1  ;;  %6492 = vmatprep.mubr.msk.f32.mxu0 %vm373_vm1, %v4420_v15  ;;  %v4390_v54 = vadd.f32 %v8040_v36, %v4351_v35  ;;  %v4272_v35 = vld [vmem:[#allocation3 + $0xa8] sm:$0xff] }
 0x31a   : > { %v4294_v41 = vadd.f32 %v6456_v47, %v4262_v49  ;;  %v4110_v59 = vpop.f32.mrb[43].mxu1  ;;  %6493 = vmatmul.mubr.msk.f32.gmra.mrb[66].mxu0 %vm373_vm1, %v4421_v27  ;;  %v4423_v4 = vmax.f32 %v4391_v37, 0.0 }
 0x31b   : > { %v4293_v57 = vadd.f32 %v4261_v55, %v4110_v59  ;;  %v4422_v61 = vmax.f32 %v4390_v54, 0.0  ;;  %v4354_v62 = vld [vmem:[#allocation3 + $0x38] sm:$0xff]  ;;  %v4271_v54 = vld [vmem:[#allocation3 + $0xa0] sm:$0xff] }
 0x31c   : > { %4326 = vst.msk [vmem:[#allocation3 + $0x58] sm:$0xff] %vm373_vm1, %v4294_v41  ;;  %v4353_v39 = vld [vmem:[#allocation3 + $0x30] sm:$0xff]  ;;  %v4393_v6 = vadd.f32 %v8040_v36, %v4354_v62 }
 0x31d   : > { %4325 = vst.msk [vmem:[#allocation3 + $0x50] sm:$0xff] %vm373_vm1, %v4293_v57  ;;  %v6459_v7 = vpop.f32.mrb[44].mxu1  ;;  %6495 = vmatprep.mubr.msk.f32.mxu0 %vm373_vm1, %v4422_v61  ;;  %v4392_v9 = vadd.f32 %v8040_v36, %v4353_v39  ;;  %v4274_v39 = vld [vmem:[#allocation3 + $0xb8] sm:$0xff] }
 0x31e   : > { %v4296_v11 = vadd.f32 %v6459_v7, %v4264_v2  ;;  %v4120_v12 = vpop.f32.mrb[45].mxu1  ;;  %6496 = vmatmul.mubr.msk.f32.gmra.mrb[68].mxu0 %vm373_vm1, %v4423_v4  ;;  %v4425_v20 = vmax.f32 %v4393_v6, 0.0 }
 0x31f   : > { %v4295_v17 = vadd.f32 %v4263_v14, %v4120_v12  ;;  %v4424_v19 = vmax.f32 %v4392_v9, 0.0  ;;  %v4356_v0 = vld [vmem:[#allocation3 + $0x48] sm:$0xff]  ;;  %v4273_v9 = vld [vmem:[#allocation3 + $0xb0] sm:$0xff] }
 0x320   : > { %4328 = vst.msk [vmem:[#allocation3 + $0x68] sm:$0xff] %vm373_vm1, %v4296_v11  ;;  %v4355_v51 = vld [vmem:[#allocation3 + $0x40] sm:$0xff]  ;;  %v4395_v21 = vadd.f32 %v8040_v36, %v4356_v0 }
 0x321   : > { %4327 = vst.msk [vmem:[#allocation3 + $0x60] sm:$0xff] %vm373_vm1, %v4295_v17  ;;  %v6462_v22 = vpop.f32.mrb[46].mxu1  ;;  %6498 = vmatprep.mubr.msk.f32.mxu0 %vm373_vm1, %v4424_v19  ;;  %v4394_v28 = vadd.f32 %v8040_v36, %v4355_v51  ;;  %v4276_v51 = vld [vmem:[#allocation3 + $0xc8] sm:$0xff] }
 0x322   : > { %v4298_v29 = vadd.f32 %v6462_v22, %v4266_v25  ;;  %v4130_v30 = vpop.f32.mrb[47].mxu1  ;;  %6499 = vmatmul.mubr.msk.f32.gmra.mrb[70].mxu0 %vm373_vm1, %v4425_v20  ;;  %v4427_v40 = vmax.f32 %v4395_v21, 0.0 }
 0x323   : > { %v4297_v63 = vadd.f32 %v4265_v31, %v4130_v30  ;;  %v4426_v33 = vmax.f32 %v4394_v28, 0.0  ;;  %v4358_v38 = vld [vmem:[#allocation3 + $0x58] sm:$0xff]  ;;  %v4275_v28 = vld [vmem:[#allocation3 + $0xc0] sm:$0xff] }
 0x324   : > { %4330 = vst.msk [vmem:[#allocation3 + $0x78] sm:$0xff] %vm373_vm1, %v4298_v29  ;;  %v4357_v43 = vld [vmem:[#allocation3 + $0x50] sm:$0xff]  ;;  %v4397_v45 = vadd.f32 %v8040_v36, %v4358_v38 }
 0x325   : > { %4329 = vst.msk [vmem:[#allocation3 + $0x70] sm:$0xff] %vm373_vm1, %v4297_v63  ;;  %v6465_v46 = vpop.f32.mrb[48].mxu1  ;;  %6501 = vmatprep.mubr.msk.f32.mxu0 %vm373_vm1, %v4426_v33  ;;  %v4396_v56 = vadd.f32 %v8040_v36, %v4357_v43  ;;  %v4278_v43 = vld [vmem:[#allocation3 + $0xd8] sm:$0xff] }
 0x326   : > { %v4300_v1 = vadd.f32 %v6465_v46, %v4268_v53  ;;  %v4140_v48 = vpop.f32.mrb[49].mxu1  ;;  %6502 = vmatmul.mubr.msk.f32.gmra.mrb[72].mxu0 %vm373_vm1, %v4427_v40  ;;  %v4429_v24 = vmax.f32 %v4397_v45, 0.0 }
 0x327   : > { %v4299_v10 = vadd.f32 %v4267_v8, %v4140_v48  ;;  %v4428_v16 = vmax.f32 %v4396_v56, 0.0  ;;  %v4360_v18 = vld [vmem:[#allocation3 + $0x68] sm:$0xff]  ;;  %v4277_v56 = vld [vmem:[#allocation3 + $0xd0] sm:$0xff] }
 0x328   : > { %4332 = vst.msk [vmem:[#allocation3 + $0x88] sm:$0xff] %vm373_vm1, %v4300_v1  ;;  %v4359_v26 = vld [vmem:[#allocation3 + $0x60] sm:$0xff]  ;;  %v4399_v32 = vadd.f32 %v8040_v36, %v4360_v18 }
 0x329   : > { %4331 = vst.msk [vmem:[#allocation3 + $0x80] sm:$0xff] %vm373_vm1, %v4299_v10  ;;  %v6468_v34 = vpop.f32.mrb[50].mxu1  ;;  %6504 = vmatprep.mubr.msk.f32.mxu0 %vm373_vm1, %v4428_v16  ;;  %v4398_v44 = vadd.f32 %v8040_v36, %v4359_v26  ;;  %v4280_v26 = vld [vmem:[#allocation3 + $0xe8] sm:$0xff] }
 0x32a   : > { %v4302_v50 = vadd.f32 %v6468_v34, %v4270_v42  ;;  %v4150_v52 = vpop.f32.mrb[51].mxu1  ;;  %6505 = vmatmul.mubr.msk.f32.gmra.mrb[74].mxu0 %vm373_vm1, %v4429_v24  ;;  %v4431_v13 = vmax.f32 %v4399_v32, 0.0 }
 0x32b   : > { %v4301_v60 = vadd.f32 %v4269_v58, %v4150_v52  ;;  %v4430_v3 = vmax.f32 %v4398_v44, 0.0  ;;  %v4362_v5 = vld [vmem:[#allocation3 + $0x78] sm:$0xff]  ;;  %v4279_v44 = vld [vmem:[#allocation3 + $0xe0] sm:$0xff] }
 0x32c   : > { %4334 = vst.msk [vmem:[#allocation3 + $0x98] sm:$0xff] %vm373_vm1, %v4302_v50  ;;  %v4361_v15 = vld [vmem:[#allocation3 + $0x70] sm:$0xff]  ;;  %v4401_v23 = vadd.f32 %v8040_v36, %v4362_v5 }
 0x32d   : > { %4333 = vst.msk [vmem:[#allocation3 + $0x90] sm:$0xff] %vm373_vm1, %v4301_v60  ;;  %v6471_v27 = vpop.f32.mrb[52].mxu1  ;;  %6507 = vmatprep.mubr.msk.f32.mxu0 %vm373_vm1, %v4430_v3  ;;  %v4400_v37 = vadd.f32 %v8040_v36, %v4361_v15  ;;  %v4282_v15 = vld [vmem:[#allocation3 + $0xf8] sm:$0xff] }
 0x32e   : > { %v4304_v47 = vadd.f32 %v6471_v27, %v4272_v35  ;;  %v4160_v49 = vpop.f32.mrb[53].mxu1  ;;  %6508 = vmatmul.mubr.msk.f32.gmra.mrb[76].mxu0 %vm373_vm1, %v4431_v13  ;;  %v4433_v57 = vmax.f32 %v4401_v23, 0.0 }
 0x32f   : > { %v4303_v41 = vadd.f32 %v4271_v54, %v4160_v49  ;;  %v4432_v59 = vmax.f32 %v4400_v37, 0.0  ;;  %v4364_v55 = vld [vmem:[#allocation3 + $0x88] sm:$0xff]  ;;  %v4281_v37 = vld [vmem:[#allocation3 + $0xf0] sm:$0xff] }
 0x330   : > { %4336 = vst.msk [vmem:[#allocation3 + $0xa8] sm:$0xff] %vm373_vm1, %v4304_v47  ;;  %v4363_v61 = vld [vmem:[#allocation3 + $0x80] sm:$0xff]  ;;  %v4403_v62 = vadd.f32 %v8040_v36, %v4364_v55 }
 0x331   : > { %4335 = vst.msk [vmem:[#allocation3 + $0xa0] sm:$0xff] %vm373_vm1, %v4303_v41  ;;  %v6474_v4 = vpop.f32.mrb[54].mxu1  ;;  %6510 = vmatprep.mubr.msk.f32.mxu0 %vm373_vm1, %v4432_v59  ;;  %v4402_v6 = vadd.f32 %v8040_v36, %v4363_v61 }
 0x332   : > { %v4306_v7 = vadd.f32 %v6474_v4, %v4274_v39  ;;  %v4170_v2 = vpop.f32.mrb[55].mxu1  ;;  %6511 = vmatmul.mubr.msk.f32.gmra.mrb[78].mxu0 %vm373_vm1, %v4433_v57  ;;  %v4435_v17 = vmax.f32 %v4403_v62, 0.0 }
 0x333   : > { %v4305_v11 = vadd.f32 %v4273_v9, %v4170_v2  ;;  %v4434_v12 = vmax.f32 %v4402_v6, 0.0  ;;  %v4366_v14 = vld [vmem:[#allocation3 + $0x98] sm:$0xff] }
 0x334   : > { %4338 = vst.msk [vmem:[#allocation3 + $0xb8] sm:$0xff] %vm373_vm1, %v4306_v7  ;;  %v4365_v19 = vld [vmem:[#allocation3 + $0x90] sm:$0xff]  ;;  %v4405_v0 = vadd.f32 %v8040_v36, %v4366_v14 }
 0x335   : > { %4337 = vst.msk [vmem:[#allocation3 + $0xb0] sm:$0xff] %vm373_vm1, %v4305_v11  ;;  %v6477_v20 = vpop.f32.mrb[56].mxu1  ;;  %6513 = vmatprep.mubr.msk.f32.mxu0 %vm373_vm1, %v4434_v12  ;;  %v4404_v21 = vadd.f32 %v8040_v36, %v4365_v19 }
 0x336   : > { %v4308_v22 = vadd.f32 %v6477_v20, %v4276_v51  ;;  %v4180_v25 = vpop.f32.mrb[57].mxu1  ;;  %6514 = vmatmul.mubr.msk.f32.gmra.mrb[80].mxu0 %vm373_vm1, %v4435_v17  ;;  %v4437_v63 = vmax.f32 %v4405_v0, 0.0  ;;  %v6884_v20 = vld [vmem:[%s6996_s16] sm:$0xff]  ;;  %v6885_v51 = vld [vmem:[%s6996_s16 + $0x8] sm:$0xff] }
 0x337   : > { %v4307_v29 = vadd.f32 %v4275_v28, %v4180_v25  ;;  %v4436_v30 = vmax.f32 %v4404_v21, 0.0  ;;  %v4368_v31 = vld [vmem:[#allocation3 + $0xa8] sm:$0xff]  ;;  %v6889_v25 = vld [vmem:[%s6996_s16 + $0x28] sm:$0xff]  ;;  %v6890_v28 = vld [vmem:[%s6996_s16 + $0x30] sm:$0xff] }
 0x338   : > { %4340 = vst.msk [vmem:[#allocation3 + $0xc8] sm:$0xff] %vm373_vm1, %v4308_v22  ;;  %v4367_v33 = vld [vmem:[#allocation3 + $0xa0] sm:$0xff]  ;;  %v4407_v38 = vadd.f32 %v8040_v36, %v4368_v31  ;;  %v6887_v21 = vld [vmem:[%s6996_s16 + $0x18] sm:$0xff]  ;;  %v6888_v22 = vld [vmem:[%s6996_s16 + $0x20] sm:$0xff] }
 0x339   : > { %4339 = vst.msk [vmem:[#allocation3 + $0xc0] sm:$0xff] %vm373_vm1, %v4307_v29  ;;  %v6480_v40 = vpop.f32.mrb[58].mxu1  ;;  %6516 = vmatprep.mubr.msk.f32.mxu0 %vm373_vm1, %v4436_v30  ;;  %v4406_v45 = vadd.f32 %v8040_v36, %v4367_v33  ;;  %v6891_v29 = vld [vmem:[%s6996_s16 + $0x38] sm:$0xff]  ;;  %v6892_v30 = vld [vmem:[%s6996_s16 + $0x40] sm:$0xff]  ;;  %v6893_v31 = vld [vmem:[%s6996_s16 + $0x48] sm:$0xff] }
 0x33a   : > { %v4310_v46 = vadd.f32 %v6480_v40, %v4278_v43  ;;  %v4190_v53 = vpop.f32.mrb[59].mxu1  ;;  %6517 = vmatmul.mubr.msk.f32.gmra.mrb[82].mxu0 %vm373_vm1, %v4437_v63  ;;  %v4439_v10 = vmax.f32 %v4407_v38, 0.0  ;;  %v6894_v63 = vld [vmem:[%s6996_s16 + $0x50] sm:$0xff]  ;;  %v6895_v33 = vld [vmem:[%s6996_s16 + $0x58] sm:$0xff]  ;;  %v6896_v38 = vld [vmem:[%s6996_s16 + $0x60] sm:$0xff] }
 0x33b   : > { %v4309_v1 = vadd.f32 %v4277_v56, %v4190_v53  ;;  %v4438_v48 = vmax.f32 %v4406_v45, 0.0  ;;  %v4370_v8 = vld [vmem:[#allocation3 + $0xb8] sm:$0xff]  ;;  %v6898_v43 = vld [vmem:[%s6996_s16 + $0x70] sm:$0xff]  ;;  %v6899_v45 = vld [vmem:[%s6996_s16 + $0x78] sm:$0xff] }
 0x33c   : > { %4342 = vst.msk [vmem:[#allocation3 + $0xd8] sm:$0xff] %vm373_vm1, %v4310_v46  ;;  %v4369_v16 = vld [vmem:[#allocation3 + $0xb0] sm:$0xff]  ;;  %v4409_v18 = vadd.f32 %v8040_v36, %v4370_v8  ;;  %v6897_v40 = vld [vmem:[%s6996_s16 + $0x68] sm:$0xff]  ;;  %v6902_v56 = vld [vmem:[%s6996_s16 + $0x90] sm:$0xff] }
 0x33d   : > { %4341 = vst.msk [vmem:[#allocation3 + $0xd0] sm:$0xff] %vm373_vm1, %v4309_v1  ;;  %v6483_v24 = vpop.f32.mrb[60].mxu1  ;;  %6519 = vmatprep.mubr.msk.f32.mxu0 %vm373_vm1, %v4438_v48  ;;  %v4408_v32 = vadd.f32 %v8040_v36, %v4369_v16  ;;  %v6900_v46 = vld [vmem:[%s6996_s16 + $0x80] sm:$0xff]  ;;  %v6901_v53 = vld [vmem:[%s6996_s16 + $0x88] sm:$0xff]  ;;  %v6903_v1 = vld [vmem:[%s6996_s16 + $0x98] sm:$0xff] }
 0x33e   : > { %v4312_v34 = vadd.f32 %v6483_v24, %v4280_v26  ;;  %v4200_v42 = vpop.f32.mrb[61].mxu1  ;;  %6520 = vmatmul.mubr.msk.f32.gmra.mrb[84].mxu0 %vm373_vm1, %v4439_v10  ;;  %v4441_v60 = vmax.f32 %v4409_v18, 0.0  ;;  %v6904_v48 = vld [vmem:[%s6996_s16 + $0xa0] sm:$0xff]  ;;  %v6905_v8 = vld [vmem:[%s6996_s16 + $0xa8] sm:$0xff]  ;;  %v6906_v10 = vld [vmem:[%s6996_s16 + $0xb0] sm:$0xff] }
 0x33f   : > { %v4311_v50 = vadd.f32 %v4279_v44, %v4200_v42  ;;  %v4440_v52 = vmax.f32 %v4408_v32, 0.0  ;;  %v4372_v58 = vld [vmem:[#allocation3 + $0xc8] sm:$0xff]  ;;  %v6908_v18 = vld [vmem:[%s6996_s16 + $0xc0] sm:$0xff]  ;;  %v6909_v24 = vld [vmem:[%s6996_s16 + $0xc8] sm:$0xff] }
 0x340   : > { %4344 = vst.msk [vmem:[#allocation3 + $0xe8] sm:$0xff] %vm373_vm1, %v4312_v34  ;;  %v4371_v3 = vld [vmem:[#allocation3 + $0xc0] sm:$0xff]  ;;  %v4411_v5 = vadd.f32 %v8040_v36, %v4372_v58  ;;  %v6907_v16 = vld [vmem:[%s6996_s16 + $0xb8] sm:$0xff]  ;;  %v6912_v34 = vld [vmem:[%s6996_s16 + $0xe0] sm:$0xff] }
 0x341   : > { %4343 = vst.msk [vmem:[#allocation3 + $0xe0] sm:$0xff] %vm373_vm1, %v4311_v50  ;;  %v6486_v13 = vpop.f32.mrb[62].mxu1  ;;  %6522 = vmatprep.mubr.msk.f32.mxu0 %vm373_vm1, %v4440_v52  ;;  %v4410_v23 = vadd.f32 %v8040_v36, %v4371_v3  ;;  %v6910_v26 = vld [vmem:[%s6996_s16 + $0xd0] sm:$0xff]  ;;  %v6911_v32 = vld [vmem:[%s6996_s16 + $0xd8] sm:$0xff]  ;;  %v6913_v42 = vld [vmem:[%s6996_s16 + $0xe8] sm:$0xff] }
 0x342   : > { %v4314_v27 = vadd.f32 %v6486_v13, %v4282_v15  ;;  %v4210_v35 = vpop.f32.mrb[63].mxu1  ;;  %6523 = vmatmul.mubr.msk.f32.gmra.mrb[86].mxu0 %vm373_vm1, %v4441_v60  ;;  %v4443_v41 = vmax.f32 %v4411_v5, 0.0  ;;  %v6914_v44 = vld [vmem:[%s6996_s16 + $0xf0] sm:$0xff]  ;;  %v6915_v50 = vld [vmem:[%s6996_s16 + $0xf8] sm:$0xff]  ;;  %v5519_v52 = vld [vmem:[%s8317_s6] ss:$0 sm:$0xff] }
 0x343   : > { %v4313_v47 = vadd.f32 %v4281_v37, %v4210_v35  ;;  %v4442_v49 = vmax.f32 %v4410_v23, 0.0  ;;  %v4374_v54 = vld [vmem:[#allocation3 + $0xd8] sm:$0xff]  ;;  %v5553_v58 = vld [vmem:[%s8319_s8] ss:$0 sm:$0xff] }
 0x344   : > { %4346 = vst.msk [vmem:[#allocation3 + $0xf8] sm:$0xff] %vm373_vm1, %v4314_v27  ;;  %v4373_v59 = vld [vmem:[#allocation3 + $0xd0] sm:$0xff]  ;;  %v4413_v55 = vadd.f32 %v8040_v36, %v4374_v54  ;;  %v8205_v5 = vadd.f32 %v5553_v58, %v5519_v52 }
 0x345   : > { %4345 = vst.msk [vmem:[#allocation3 + $0xf0] sm:$0xff] %vm373_vm1, %v4313_v47  ;;  %6525 = vmatprep.mubr.msk.f32.mxu0 %vm373_vm1, %v4442_v49  ;;  %v4412_v57 = vadd.f32 %v8040_v36, %v4373_v59 }
 0x346   : > { %6526 = vmatmul.mubr.msk.f32.gmra.mrb[88].mxu0 %vm373_vm1, %v4443_v41  ;;  %v4445_v4 = vmax.f32 %v4413_v55, 0.0 }
 0x347   : > { %v4444_v61 = vmax.f32 %v4412_v57, 0.0  ;;  %v4376_v62 = vld [vmem:[#allocation3 + $0xe8] sm:$0xff] }
 0x348   : > { %v4375_v39 = vld [vmem:[#allocation3 + $0xe0] sm:$0xff]  ;;  %v4415_v6 = vadd.f32 %v8040_v36, %v4376_v62 }
 0x349   : > { %6528 = vmatprep.mubr.msk.f32.mxu0 %vm373_vm1, %v4444_v61  ;;  %v4414_v7 = vadd.f32 %v8040_v36, %v4375_v39 }
 0x34a   : > { %6529 = vmatmul.mubr.msk.f32.gmra.mrb[90].mxu0 %vm373_vm1, %v4445_v4  ;;  %v4447_v11 = vmax.f32 %v4415_v6, 0.0 }
 0x34b   : > { %v4446_v2 = vmax.f32 %v4414_v7, 0.0  ;;  %v4378_v9 = vld [vmem:[#allocation3 + $0xf8] sm:$0xff] }
 0x34c   : > { %v4377_v12 = vld [vmem:[#allocation3 + $0xf0] sm:$0xff]  ;;  %v4417_v14 = vadd.f32 %v8040_v36, %v4378_v9 }
 0x34d   : > { %6531 = vmatprep.mubr.msk.f32.mxu0 %vm373_vm1, %v4446_v2  ;;  %v4416_v17 = vadd.f32 %v8040_v36, %v4377_v12  ;;  %v6886_v36 = vld [vmem:[%s6996_s16 + $0x10] sm:$0xff] }
 0x34e   : > { %6532 = vmatmul.mubr.msk.f32.gmra.mrb[92].mxu0 %vm373_vm1, %v4447_v11  ;;  %v4449_v0 = vmax.f32 %v4417_v14, 0.0 }
 0x34f   : > { %v4448_v19 = vmax.f32 %v4416_v17, 0.0 }
 0x351   : > { %6534 = vmatprep.mubr.msk.f32.mxu0 %vm373_vm1, %v4448_v19 }
 0x352   : > { %6535 = vmatmul.mubr.msk.f32.gmra.mrb[94].mxu0 %vm373_vm1, %v4449_v0 }
 0x353   : > { %6539 = vmatprep.mubr.msk.f32.mxu0 %vm373_vm1, %v6884_v20 }
 0x356   : > { %6540 = vmatmul.mubr.msk.f32.vlgmr.msra.gmra.mrb[64].mxu0 %vm373_vm1, %v6885_v51 }
 0x357   : > { %6542 = vmatprep.mubr.msk.f32.mxu0 %vm373_vm1, %v6886_v36 }
 0x35a   : > { %6543 = vmatmul.mubr.msk.f32.gmra.mrb[66].mxu0 %vm373_vm1, %v6887_v21 }
 0x35b   : > { %6545 = vmatprep.mubr.msk.f32.mxu0 %vm373_vm1, %v6888_v22 }
 0x35e   : > { %6546 = vmatmul.mubr.msk.f32.gmra.mrb[68].mxu0 %vm373_vm1, %v6889_v25 }
 0x35f   : > { %6548 = vmatprep.mubr.msk.f32.mxu0 %vm373_vm1, %v6890_v28 }
 0x362   : > { %6549 = vmatmul.mubr.msk.f32.gmra.mrb[70].mxu0 %vm373_vm1, %v6891_v29 }
 0x363   : > { %6551 = vmatprep.mubr.msk.f32.mxu0 %vm373_vm1, %v6892_v30 }
 0x366   : > { %6552 = vmatmul.mubr.msk.f32.gmra.mrb[72].mxu0 %vm373_vm1, %v6893_v31 }
 0x367   : > { %6554 = vmatprep.mubr.msk.f32.mxu0 %vm373_vm1, %v6894_v63 }
 0x36a   : > { %6555 = vmatmul.mubr.msk.f32.gmra.mrb[74].mxu0 %vm373_vm1, %v6895_v33 }
 0x36b   : > { %6557 = vmatprep.mubr.msk.f32.mxu0 %vm373_vm1, %v6896_v38 }
 0x36e   : > { %6558 = vmatmul.mubr.msk.f32.gmra.mrb[76].mxu0 %vm373_vm1, %v6897_v40 }
 0x36f   : > { %6560 = vmatprep.mubr.msk.f32.mxu0 %vm373_vm1, %v6898_v43 }
 0x372   : > { %6561 = vmatmul.mubr.msk.f32.gmra.mrb[78].mxu0 %vm373_vm1, %v6899_v45 }
 0x373   : > { %6563 = vmatprep.mubr.msk.f32.mxu0 %vm373_vm1, %v6900_v46 }
 0x376   : > { %6564 = vmatmul.mubr.msk.f32.gmra.mrb[80].mxu0 %vm373_vm1, %v6901_v53 }
 0x377   : > { %6566 = vmatprep.mubr.msk.f32.mxu0 %vm373_vm1, %v6902_v56 }
 0x37a   : > { %6567 = vmatmul.mubr.msk.f32.gmra.mrb[82].mxu0 %vm373_vm1, %v6903_v1 }
 0x37b   : > { %6569 = vmatprep.mubr.msk.f32.mxu0 %vm373_vm1, %v6904_v48 }
 0x37e   : > { %6570 = vmatmul.mubr.msk.f32.gmra.mrb[84].mxu0 %vm373_vm1, %v6905_v8 }
 0x37f   : > { %6572 = vmatprep.mubr.msk.f32.mxu0 %vm373_vm1, %v6906_v10 }
 0x382   : > { %6573 = vmatmul.mubr.msk.f32.gmra.mrb[86].mxu0 %vm373_vm1, %v6907_v16 }
 0x383   : > { %6575 = vmatprep.mubr.msk.f32.mxu0 %vm373_vm1, %v6908_v18 }
 0x386   : > { %6576 = vmatmul.mubr.msk.f32.gmra.mrb[88].mxu0 %vm373_vm1, %v6909_v24 }
 0x387   : > { %6578 = vmatprep.mubr.msk.f32.mxu0 %vm373_vm1, %v6910_v26 }
 0x38a   : > { %6579 = vmatmul.mubr.msk.f32.gmra.mrb[90].mxu0 %vm373_vm1, %v6911_v32 }
 0x38b   : > { %6581 = vmatprep.mubr.msk.f32.mxu0 %vm373_vm1, %v6912_v34 }
 0x38e   : > { %6582 = vmatmul.mubr.msk.f32.gmra.mrb[92].mxu0 %vm373_vm1, %v6913_v42 }
 0x38f   : > { %6584 = vmatprep.mubr.msk.f32.mxu0 %vm373_vm1, %v6914_v44 }
 0x392   : > { %6585 = vmatmul.mubr.msk.f32.gmra.mrb[94].mxu0 %vm373_vm1, %v6915_v50 }
 0x429   : > { %v6541_v60 = vpop.f32.mrb[64].mxu0 }
 0x42a   : > { %v6587_v3 = vadd.f32 %v6541_v60, %v5519_v52  ;;  %v4859_v13 = vpop.f32.mrb[65].mxu0 }
 0x42b   : > { %v6589_v15 = vadd.f32 %v5519_v52, %v4859_v13 }
 0x42c   : > { %v6588_v23 = vadd.f32 %v6587_v3, %v5553_v58 }
 0x42d   : > { %v6590_v27 = vadd.f32 %v6589_v15, %v5553_v58  ;;  %v6544_v35 = vpop.f32.mrb[66].mxu0 }
 0x42e   : > { %v5051_v37 = vmax.f32 %v6588_v23, 0.0  ;;  %v6592_v47 = vadd.f32 %v8205_v5, %v6544_v35  ;;  %v4869_v49 = vpop.f32.mrb[67].mxu0 }
 0x42f   : > { %v5050_v54 = vmax.f32 %v6590_v27, 0.0  ;;  %v6594_v41 = vadd.f32 %v8205_v5, %v4869_v49 }
 0x430   : > { %5084 = vst.msk [vmem:[%s8212_s12 + $0x8] sm:$0xff] %vm5082_vm4, %v5051_v37  ;;  %v5053_v59 = vmax.f32 %v6592_v47, 0.0 }
 0x431   : > { %5083 = vst.msk [vmem:[%s8212_s12] sm:$0xff] %vm5082_vm4, %v5050_v54  ;;  %v5052_v55 = vmax.f32 %v6594_v41, 0.0  ;;  %v6547_v57 = vpop.f32.mrb[68].mxu0 }
 0x432   : > { %5086 = vst.msk [vmem:[%s8212_s12 + $0x18] sm:$0xff] %vm5082_vm4, %v5053_v59  ;;  %v6596_v61 = vadd.f32 %v8205_v5, %v6547_v57  ;;  %v4879_v62 = vpop.f32.mrb[69].mxu0 }
 0x433   : > { %5085 = vst.msk [vmem:[%s8212_s12 + $0x10] sm:$0xff] %vm5082_vm4, %v5052_v55  ;;  %v6598_v4 = vadd.f32 %v8205_v5, %v4879_v62 }
 0x434   : > { %v5055_v39 = vmax.f32 %v6596_v61, 0.0 }
 0x435   : > { %v5054_v6 = vmax.f32 %v6598_v4, 0.0  ;;  %v6550_v7 = vpop.f32.mrb[70].mxu0 }
 0x436   : > { %5088 = vst.msk [vmem:[%s8212_s12 + $0x28] sm:$0xff] %vm5082_vm4, %v5055_v39  ;;  %v6600_v2 = vadd.f32 %v8205_v5, %v6550_v7  ;;  %v4889_v9 = vpop.f32.mrb[71].mxu0 }
 0x437   : > { %5087 = vst.msk [vmem:[%s8212_s12 + $0x20] sm:$0xff] %vm5082_vm4, %v5054_v6  ;;  %v6602_v11 = vadd.f32 %v8205_v5, %v4889_v9 }
 0x438   : > { %v5057_v12 = vmax.f32 %v6600_v2, 0.0 }
 0x439   : > { %v5056_v14 = vmax.f32 %v6602_v11, 0.0  ;;  %v6553_v17 = vpop.f32.mrb[72].mxu0 }
 0x43a   : > { %5090 = vst.msk [vmem:[%s8212_s12 + $0x38] sm:$0xff] %vm5082_vm4, %v5057_v12  ;;  %v6604_v19 = vadd.f32 %v8205_v5, %v6553_v17  ;;  %v4899_v0 = vpop.f32.mrb[73].mxu0 }
 0x43b   : > { %5089 = vst.msk [vmem:[%s8212_s12 + $0x30] sm:$0xff] %vm5082_vm4, %v5056_v14  ;;  %v6606_v20 = vadd.f32 %v8205_v5, %v4899_v0 }
 0x43c   : > { %v5059_v51 = vmax.f32 %v6604_v19, 0.0 }
 0x43d   : > { %v5058_v36 = vmax.f32 %v6606_v20, 0.0  ;;  %v6556_v21 = vpop.f32.mrb[74].mxu0 }
 0x43e   : > { %5092 = vst.msk [vmem:[%s8212_s12 + $0x48] sm:$0xff] %vm5082_vm4, %v5059_v51  ;;  %v6608_v22 = vadd.f32 %v8205_v5, %v6556_v21  ;;  %v4909_v25 = vpop.f32.mrb[75].mxu0 }
 0x43f   : > { %5091 = vst.msk [vmem:[%s8212_s12 + $0x40] sm:$0xff] %vm5082_vm4, %v5058_v36  ;;  %v6610_v28 = vadd.f32 %v8205_v5, %v4909_v25 }
 0x440   : > { %v5061_v29 = vmax.f32 %v6608_v22, 0.0 }
 0x441   : > { %v5060_v30 = vmax.f32 %v6610_v28, 0.0  ;;  %v6559_v31 = vpop.f32.mrb[76].mxu0 }
 0x442   : > { %5094 = vst.msk [vmem:[%s8212_s12 + $0x58] sm:$0xff] %vm5082_vm4, %v5061_v29  ;;  %v6612_v63 = vadd.f32 %v8205_v5, %v6559_v31  ;;  %v4919_v33 = vpop.f32.mrb[77].mxu0 }
 0x443   : > { %5093 = vst.msk [vmem:[%s8212_s12 + $0x50] sm:$0xff] %vm5082_vm4, %v5060_v30  ;;  %v6614_v38 = vadd.f32 %v8205_v5, %v4919_v33 }
 0x444   : > { %v5063_v40 = vmax.f32 %v6612_v63, 0.0 }
 0x445   : > { %v5062_v43 = vmax.f32 %v6614_v38, 0.0  ;;  %v6562_v45 = vpop.f32.mrb[78].mxu0 }
 0x446   : > { %5096 = vst.msk [vmem:[%s8212_s12 + $0x68] sm:$0xff] %vm5082_vm4, %v5063_v40  ;;  %v6616_v46 = vadd.f32 %v8205_v5, %v6562_v45  ;;  %v4929_v53 = vpop.f32.mrb[79].mxu0 }
 0x447   : > { %5095 = vst.msk [vmem:[%s8212_s12 + $0x60] sm:$0xff] %vm5082_vm4, %v5062_v43  ;;  %v6618_v56 = vadd.f32 %v8205_v5, %v4929_v53 }
 0x448   : > { %v5065_v1 = vmax.f32 %v6616_v46, 0.0 }
 0x449   : > { %v5064_v48 = vmax.f32 %v6618_v56, 0.0  ;;  %v6565_v8 = vpop.f32.mrb[80].mxu0 }
 0x44a   : > { %5098 = vst.msk [vmem:[%s8212_s12 + $0x78] sm:$0xff] %vm5082_vm4, %v5065_v1  ;;  %v6620_v10 = vadd.f32 %v8205_v5, %v6565_v8  ;;  %v4939_v16 = vpop.f32.mrb[81].mxu0 }
 0x44b   : > { %5097 = vst.msk [vmem:[%s8212_s12 + $0x70] sm:$0xff] %vm5082_vm4, %v5064_v48  ;;  %v6622_v18 = vadd.f32 %v8205_v5, %v4939_v16 }
 0x44c   : > { %v5067_v24 = vmax.f32 %v6620_v10, 0.0 }
 0x44d   : > { %v5066_v26 = vmax.f32 %v6622_v18, 0.0  ;;  %v6568_v32 = vpop.f32.mrb[82].mxu0 }
 0x44e   : > { %5100 = vst.msk [vmem:[%s8212_s12 + $0x88] sm:$0xff] %vm5082_vm4, %v5067_v24  ;;  %v6624_v34 = vadd.f32 %v8205_v5, %v6568_v32  ;;  %v4949_v42 = vpop.f32.mrb[83].mxu0 }
 0x44f   : > { %5099 = vst.msk [vmem:[%s8212_s12 + $0x80] sm:$0xff] %vm5082_vm4, %v5066_v26  ;;  %v6626_v44 = vadd.f32 %v8205_v5, %v4949_v42 }
 0x450   : > { %v5069_v50 = vmax.f32 %v6624_v34, 0.0 }
 0x451   : > { %v5068_v52 = vmax.f32 %v6626_v44, 0.0  ;;  %v6571_v58 = vpop.f32.mrb[84].mxu0 }
 0x452   : > { %5102 = vst.msk [vmem:[%s8212_s12 + $0x98] sm:$0xff] %vm5082_vm4, %v5069_v50  ;;  %v6628_v60 = vadd.f32 %v8205_v5, %v6571_v58  ;;  %v4959_v3 = vpop.f32.mrb[85].mxu0 }
 0x453   : > { %5101 = vst.msk [vmem:[%s8212_s12 + $0x90] sm:$0xff] %vm5082_vm4, %v5068_v52  ;;  %v6630_v13 = vadd.f32 %v8205_v5, %v4959_v3 }
 0x454   : > { %v5071_v15 = vmax.f32 %v6628_v60, 0.0 }
 0x455   : > { %v5070_v23 = vmax.f32 %v6630_v13, 0.0  ;;  %v6574_v27 = vpop.f32.mrb[86].mxu0 }
 0x456   : > { %5104 = vst.msk [vmem:[%s8212_s12 + $0xa8] sm:$0xff] %vm5082_vm4, %v5071_v15  ;;  %v6632_v35 = vadd.f32 %v8205_v5, %v6574_v27  ;;  %v4969_v37 = vpop.f32.mrb[87].mxu0 }
 0x457   : > { %5103 = vst.msk [vmem:[%s8212_s12 + $0xa0] sm:$0xff] %vm5082_vm4, %v5070_v23  ;;  %v6634_v47 = vadd.f32 %v8205_v5, %v4969_v37 }
 0x458   : > { %v5073_v49 = vmax.f32 %v6632_v35, 0.0 }
 0x459   : > { %v5072_v54 = vmax.f32 %v6634_v47, 0.0  ;;  %v6577_v41 = vpop.f32.mrb[88].mxu0 }
 0x45a   : > { %5106 = vst.msk [vmem:[%s8212_s12 + $0xb8] sm:$0xff] %vm5082_vm4, %v5073_v49  ;;  %v6636_v59 = vadd.f32 %v8205_v5, %v6577_v41  ;;  %v4979_v55 = vpop.f32.mrb[89].mxu0 }
 0x45b   : > { %5105 = vst.msk [vmem:[%s8212_s12 + $0xb0] sm:$0xff] %vm5082_vm4, %v5072_v54  ;;  %v6638_v57 = vadd.f32 %v8205_v5, %v4979_v55 }
 0x45c   : > { %v5075_v61 = vmax.f32 %v6636_v59, 0.0 }
 0x45d   : > { %v5074_v62 = vmax.f32 %v6638_v57, 0.0  ;;  %v6580_v4 = vpop.f32.mrb[90].mxu0 }
 0x45e   : > { %5108 = vst.msk [vmem:[%s8212_s12 + $0xc8] sm:$0xff] %vm5082_vm4, %v5075_v61  ;;  %v6640_v39 = vadd.f32 %v8205_v5, %v6580_v4  ;;  %v4989_v6 = vpop.f32.mrb[91].mxu0 }
 0x45f   : > { %5107 = vst.msk [vmem:[%s8212_s12 + $0xc0] sm:$0xff] %vm5082_vm4, %v5074_v62  ;;  %v6642_v7 = vadd.f32 %v8205_v5, %v4989_v6 }
 0x460   : > { %v5077_v2 = vmax.f32 %v6640_v39, 0.0 }
 0x461   : > { %v5076_v9 = vmax.f32 %v6642_v7, 0.0  ;;  %v6583_v11 = vpop.f32.mrb[92].mxu0 }
 0x462   : > { %5110 = vst.msk [vmem:[%s8212_s12 + $0xd8] sm:$0xff] %vm5082_vm4, %v5077_v2  ;;  %v6644_v12 = vadd.f32 %v8205_v5, %v6583_v11  ;;  %v4999_v14 = vpop.f32.mrb[93].mxu0 }
 0x463   : > { %5109 = vst.msk [vmem:[%s8212_s12 + $0xd0] sm:$0xff] %vm5082_vm4, %v5076_v9  ;;  %v6646_v17 = vadd.f32 %v8205_v5, %v4999_v14 }
 0x464   : > { %v5079_v19 = vmax.f32 %v6644_v12, 0.0 }
 0x465   : > { %v5078_v0 = vmax.f32 %v6646_v17, 0.0  ;;  %v6586_v20 = vpop.f32.mrb[94].mxu0 }
 0x466   : > { %5112 = vst.msk [vmem:[%s8212_s12 + $0xe8] sm:$0xff] %vm5082_vm4, %v5079_v19  ;;  %v6648_v51 = vadd.f32 %v8205_v5, %v6586_v20  ;;  %v5009_v36 = vpop.f32.mrb[95].mxu0 }
 0x467   : > { %5111 = vst.msk [vmem:[%s8212_s12 + $0xe0] sm:$0xff] %vm5082_vm4, %v5078_v0  ;;  %v6650_v21 = vadd.f32 %v8205_v5, %v5009_v36 }
 0x468   : > { %v5081_v22 = vmax.f32 %v6648_v51, 0.0 }
 0x469   : > { %v5080_v25 = vmax.f32 %v6650_v21, 0.0 }
 0x46a   : > { %5114 = vst.msk [vmem:[%s8212_s12 + $0xf8] sm:$0xff] %vm5082_vm4, %v5081_v22 }
 0x46b   : > { %5113 = vst.msk [vmem:[%s8212_s12 + $0xf0] sm:$0xff] %vm5082_vm4, %v5080_v25 }
 0x46c PF: > { %s19_s30 = sadd.s32 1, %s6922_s30  }
 0x46d   : > { %p16_p4 = scmp.ge.s32.totalorder %s19_s30, 4  }
 0x46f   :  { %18 = sbr.rel (!%p16_p4) target bundleno = 1 (0x1), region = 97 }

</bundles_post_ra>
